<compile_context>
chip_gen: v6e
topology: v6e:2x2x1
jax: 0.10.0
libtpu: 0.0.40
codegen_flags: <defaults>
</compile_context>

<pallas_src>
import functools

import numpy as np
import jax
import jax.numpy as jnp
from jax import lax
from jax.experimental import pallas as pl
from jax.experimental.pallas import tpu as pltpu

BN_EPS = 1e-5


# ---------------------------------------------------------------------------
# Fused Attention kernel: one grid step per batch element.
# ---------------------------------------------------------------------------
def _attention_kernel(x_ref, w3m_ref, wblk_ref, bias3_ref, sel_ref,
                      maskkv_ref, segsum_ref, wp_ref, bp_ref, o_ref,
                      *, spatial, num_heads):
    sh, sw, sd = spatial
    x = x_ref[0]                               # (T, C) tokens of this batch elem
    T, _ = x.shape
    Co = wp_ref.shape[1]
    Tk = sel_ref.shape[0]
    H = num_heads

    # ---- depthwise 3x3x3 conv, q|k|v lane-packed (T, 3C) --------------------
    # w3m[tap, t, :] = boundary_mask[tap, t] * (tap_weight * bn_scale) is folded
    # on the host, so each tap is ONE pltpu.roll (XLU) + ONE FMA (VPU).
    x3 = jnp.concatenate([x, x, x], axis=1)    # (T, 3C)
    center = 13                                # tap (dh, dw, dd) == (0, 0, 0)
    acc3 = x3 * w3m_ref[center]
    tap = 0
    for dh in (-1, 0, 1):
        for dw_ in (-1, 0, 1):
            for dd in (-1, 0, 1):
                if tap != center:
                    r = dh * (sw * sd) + dw_ * sd + dd   # token offset of tap
                    shift = (-r) % T                     # want out[t] = x3[t + r]
                    rolled = pltpu.roll(x3, shift=shift, axis=0) if shift else x3
                    # wrapped / out-of-bounds rows are zeroed by the folded mask
                    acc3 = acc3 + rolled * w3m_ref[tap]
                tap += 1

    # ---- block-diagonal q/k/v linear projection ------------------------------
    # BN shift -> bias3, attention scale -> q block of wblk/bias3 (host-folded).
    qkv = jnp.dot(acc3, wblk_ref[...],
                  preferred_element_type=jnp.float32) + bias3_ref[...]  # (T, 3Co)
    q = qkv[:, :Co]                                                      # (T, Co)

    # ---- stride-2 k/v voxel subsample as a constant 0/1 row-selection matmul -
    # TODO(synk): for large T replace the O(Tk*T) selector with a strided
    # index_map / DMA (v7x VMEM headroom).
    kv = jnp.dot(sel_ref[...], qkv[:, Co:],
                 preferred_element_type=jnp.float32)                     # (Tk, 2Co)
    k_s = kv[:, :Co]
    v_s = kv[:, Co:]

    # ---- multi-head attention, heads kept in lanes ---------------------------
    # Expand K/V to a (H*Tk, Co) block structure: row h*Tk+t' holds head h's
    # channels of key/value t' (all other channels zeroed by the constant mask).
    maskkv = maskkv_ref[...]                                             # (H*Tk, Co)
    k_exp = jnp.concatenate([k_s] * H, axis=0) * maskkv
    v_exp = jnp.concatenate([v_s] * H, axis=0) * maskkv
    s = lax.dot_general(q, k_exp, (((1,), (1,)), ((), ())),
                        preferred_element_type=jnp.float32)              # (T, H*Tk)

    # segmented softmax over each head's Tk keys (lane segments of width Tk)
    m_parts = []
    for hh in range(H):
        mh = jnp.max(s[:, hh * Tk:(hh + 1) * Tk], axis=-1, keepdims=True)
        m_parts.append(jnp.broadcast_to(mh, (T, Tk)))
    e = jnp.exp(s - jnp.concatenate(m_parts, axis=1))
    denom = jnp.dot(e, segsum_ref[...], preferred_element_type=jnp.float32)
    p = e / denom                                                        # (T, H*Tk)

    # context comes back with heads merged along lanes: (T, Co)
    ctx = jnp.dot(p, v_exp, preferred_element_type=jnp.float32)

    # ---- output projection (head reduction rides the MXU) + bias -------------
    out = jnp.dot(ctx, wp_ref[...], preferred_element_type=jnp.float32) + bp_ref[...]
    o_ref[0] = out.astype(o_ref.dtype)


# ---------------------------------------------------------------------------
# Compile-time constants: conv boundary masks and stride-2 row selector.
# ---------------------------------------------------------------------------
@functools.lru_cache(maxsize=None)
def _conv_constants(h, w, d):
    """(27, T) boundary masks for the 3x3x3 stencil and the (Tk, T) stride-2
    voxel-selection matrix.  Vectorized numpy, cached across traces."""
    T = h * w * d
    idx = np.arange(T)
    ih, iw, idp = idx // (w * d), (idx // d) % w, idx % d
    masks = np.zeros((27, T), np.float32)
    tap = 0
    for dh in (-1, 0, 1):
        for dw_ in (-1, 0, 1):
            for dd in (-1, 0, 1):
                ok = ((ih + dh >= 0) & (ih + dh < h) &
                      (iw + dw_ >= 0) & (iw + dw_ < w) &
                      (idp + dd >= 0) & (idp + dd < d))
                masks[tap] = ok.astype(np.float32)
                tap += 1
    nh, nw, nd = (h - 1) // 2 + 1, (w - 1) // 2 + 1, (d - 1) // 2 + 1
    Tk = nh * nw * nd
    rows = np.arange(Tk)
    src = (2 * (rows // (nw * nd)) * w + 2 * ((rows // nd) % nw)) * d + 2 * (rows % nd)
    sel = np.zeros((Tk, T), np.float32)
    sel[rows, src] = 1.0
    return masks, sel


# ---------------------------------------------------------------------------
# Wrapper: host-side constant folding + the single fused pallas_call.
# ---------------------------------------------------------------------------
def attention_forward(x, p, h, w, d, num_heads):
    B, T, C = x.shape
    assert T == h * w * d
    Co = p["Wq"].shape[1]
    H = num_heads
    assert Co % H == 0
    hd = Co // H

    masks_np, sel_np = _conv_constants(h, w, d)
    Tk = sel_np.shape[0]

    # ---- host-side constant folding (free at weight-prep time) --------------
    scale = float(Co) ** (-0.5)   # module uses dim_out**-0.5 (not head_dim**-0.5)

    # BN scale folded into the depthwise taps; q/k/v taps lane-packed; the
    # per-token boundary masks folded in -> one (27, T, 3C) FMA slab.
    # TODO(synk): for very large T keep masks separate (lane-dense (27, T))
    # instead of the folded slab to bound VMEM (v7x: 64 MiB).
    w3 = jnp.concatenate([p["dw_q"] * p["bnq_s"][None, :],
                          p["dw_k"] * p["bnk_s"][None, :],
                          p["dw_v"] * p["bnv_s"][None, :]], axis=1)       # (27, 3C)
    w3m = jnp.asarray(masks_np)[:, :, None] * w3[:, None, :]              # (27, T, 3C)

    # Block-diagonal linear projection; attention scale folded into the q block,
    # BN shift folded into a per-path projection bias.
    Z = jnp.zeros((C, Co), jnp.float32)
    wblk = jnp.concatenate([
        jnp.concatenate([p["Wq"] * scale, Z, Z], axis=1),
        jnp.concatenate([Z, p["Wk"], Z], axis=1),
        jnp.concatenate([Z, Z, p["Wv"]], axis=1)], axis=0)                # (3C, 3Co)
    bias3 = jnp.concatenate([(p["bnq_h"] @ p["Wq"]) * scale,
                             p["bnk_h"] @ p["Wk"],
                             p["bnv_h"] @ p["Wv"]])[None, :]              # (1, 3Co)

    sel = jnp.asarray(sel_np)                                             # (Tk, T)
    maskkv = jnp.asarray((np.arange(H * Tk)[:, None] // Tk ==
                          np.arange(Co)[None, :] // hd).astype(np.float32))
    segsum = jnp.asarray((np.arange(H * Tk)[:, None] // Tk ==
                          np.arange(H * Tk)[None, :] // Tk).astype(np.float32))

    kernel = functools.partial(_attention_kernel, spatial=(h, w, d),
                               num_heads=H)

    def fixed(a):
        n = a.ndim
        return pl.BlockSpec(a.shape, lambda b, _n=n: (0,) * _n)

    # TODO(synk): on single-TC chips (v5e/v6e) with tiny B, fold the batch into
    # the token axis instead of a short serial grid; kept (B,) "parallel" so
    # v7x shards batches across both TensorCores.
    return pl.pallas_call(
        kernel,
        out_shape=jax.ShapeDtypeStruct((B, T, Co), x.dtype),
        grid=(B,),
        in_specs=[
            pl.BlockSpec((1, T, C), lambda b: (b, 0, 0)),   # tokens of batch b
            fixed(w3m),        # folded masked/BN-scaled depthwise taps
            fixed(wblk),       # block-diag q/k/v projection (scale folded)
            fixed(bias3),      # folded BN-shift projection biases
            fixed(sel),        # stride-2 voxel selector
            fixed(maskkv),     # head block mask for K/V expansion
            fixed(segsum),     # per-head softmax denominator selector
            fixed(p["Wp"]),    # output projection
            fixed(p["bp"]),    # output projection bias
        ],
        out_specs=pl.BlockSpec((1, T, Co), lambda b: (b, 0, 0)),
        compiler_params=pltpu.CompilerParams(
            dimension_semantics=("parallel",)),
    )(x, w3m, wblk, bias3, sel, maskkv, segsum, p["Wp"], p["bp"])


# ---------------------------------------------------------------------------
# Deterministic parameter construction
# ---------------------------------------------------------------------------
def make_params(key, dim_in, dim_out, num_heads, kernel_size=3):
    assert dim_out % num_heads == 0
    # TODO(synk): kernel hardcodes the 27-tap 3x3x3 stencil (module default).
    assert kernel_size == 3
    ks = iter(jax.random.split(key, 32))
    nrm = lambda k, shape, sc=0.05: (jax.random.normal(k, shape) * sc).astype(jnp.float32)
    C, Co = dim_in, dim_out
    K3 = kernel_size ** 3

    def bn_fold(kg, kb, km, kv):
        gamma = 1.0 + nrm(kg, (C,), 0.1)
        beta = nrm(kb, (C,), 0.1)
        mean = nrm(km, (C,), 0.1)
        var = 1.0 + jnp.abs(nrm(kv, (C,), 0.1))
        s = gamma * jax.lax.rsqrt(var + BN_EPS)
        return s, beta - mean * s

    p = {
        "dw_q": nrm(next(ks), (K3, C), 0.2),   # depthwise taps, (27, C)
        "dw_k": nrm(next(ks), (K3, C), 0.2),
        "dw_v": nrm(next(ks), (K3, C), 0.2),
        "Wq": nrm(next(ks), (C, Co)),
        "Wk": nrm(next(ks), (C, Co)),
        "Wv": nrm(next(ks), (C, Co)),
        "Wp": nrm(next(ks), (Co, Co)),
        "bp": nrm(next(ks), (1, Co)),
    }
    p["bnq_s"], p["bnq_h"] = bn_fold(next(ks), next(ks), next(ks), next(ks))
    p["bnk_s"], p["bnk_h"] = bn_fold(next(ks), next(ks), next(ks), next(ks))
    p["bnv_s"], p["bnv_h"] = bn_fold(next(ks), next(ks), next(ks), next(ks))
    return p


if __name__ == "__main__":
    # Small, module-consistent shapes: B=2, h=w=d=4 (T=64 tokens), dim=32, 4 heads.
    B, h, w, d = 2, 4, 4, 4
    dim_in = dim_out = 32
    num_heads = 4
    T = h * w * d

    key = jax.random.PRNGKey(0)
    kx, kp = jax.random.split(key)
    x = jax.random.normal(kx, (B, T, dim_in), dtype=jnp.float32)
    params = make_params(kp, dim_in, dim_out, num_heads)

    out = attention_forward(x, params, h, w, d, num_heads)
    out = jax.block_until_ready(out)
    assert out.shape == (B, T, dim_out) and out.dtype == jnp.float32
    assert bool(jnp.all(jnp.isfinite(out)))
    print("KERNEL_OK")
</pallas_src>

<mosaic_0001>
module attributes {stable_mosaic.version = 11 : i64} {
  func.func @_attention_kernel(%arg0: i32, %arg1: memref<1x64x32xf32, #tpu.memory_space<vmem>>, %arg2: memref<27x64x96xf32, #tpu.memory_space<vmem>>, %arg3: memref<96x96xf32, #tpu.memory_space<vmem>>, %arg4: memref<1x96xf32, #tpu.memory_space<vmem>>, %arg5: memref<8x64xf32, #tpu.memory_space<vmem>>, %arg6: memref<32x32xf32, #tpu.memory_space<vmem>>, %arg7: memref<32x32xf32, #tpu.memory_space<vmem>>, %arg8: memref<32x32xf32, #tpu.memory_space<vmem>>, %arg9: memref<1x32xf32, #tpu.memory_space<vmem>>, %arg10: memref<1x64x32xf32, #tpu.memory_space<vmem>>) attributes {dimension_semantics = [#tpu.dimension_semantics<parallel>], iteration_bounds = array<i64: 2>, scalar_prefetch = 0 : i64, scratch_operands = 0 : i64, tpu.core_type = #tpu.core_type<tc>, window_params = [{transform_indices = @transform_0, window_bounds = array<i64: 1, 64, 32>}, {pipeline_mode = #tpu.pipeline_mode<synchronous>, transform_indices = @transform_1, window_bounds = array<i64: 27, 64, 96>}, {pipeline_mode = #tpu.pipeline_mode<synchronous>, transform_indices = @transform_2, window_bounds = array<i64: 96, 96>}, {pipeline_mode = #tpu.pipeline_mode<synchronous>, transform_indices = @transform_3, window_bounds = array<i64: 1, 96>}, {pipeline_mode = #tpu.pipeline_mode<synchronous>, transform_indices = @transform_4, window_bounds = array<i64: 8, 64>}, {pipeline_mode = #tpu.pipeline_mode<synchronous>, transform_indices = @transform_5, window_bounds = array<i64: 32, 32>}, {pipeline_mode = #tpu.pipeline_mode<synchronous>, transform_indices = @transform_6, window_bounds = array<i64: 32, 32>}, {pipeline_mode = #tpu.pipeline_mode<synchronous>, transform_indices = @transform_7, window_bounds = array<i64: 32, 32>}, {pipeline_mode = #tpu.pipeline_mode<synchronous>, transform_indices = @transform_8, window_bounds = array<i64: 1, 32>}, {transform_indices = @transform_9, window_bounds = array<i64: 1, 64, 32>}]} {
    %c0 = arith.constant 0 : index
    %c0_0 = arith.constant 0 : index
    %c0_1 = arith.constant 0 : index
    %0 = vector.load %arg1[%c0, %c0_0, %c0_1] : memref<1x64x32xf32, #tpu.memory_space<vmem>>, vector<1x64x32xf32>
    %1 = vector.shape_cast %0 : vector<1x64x32xf32> to vector<64x32xf32>
    %2 = tpu.concatenate %1, %1, %1 in 1 : vector<64x32xf32>, vector<64x32xf32>, vector<64x32xf32> -> vector<64x96xf32>
    %c13 = arith.constant 13 : index
    %c0_2 = arith.constant 0 : index
    %c0_3 = arith.constant 0 : index
    %3 = vector.load %arg2[%c13, %c0_2, %c0_3] : memref<27x64x96xf32, #tpu.memory_space<vmem>>, vector<1x64x96xf32>
    %4 = vector.shape_cast %3 : vector<1x64x96xf32> to vector<64x96xf32>
    %5 = arith.mulf %2, %4 : vector<64x96xf32>
    %c21_i32 = arith.constant 21 : i32
    %6 = tpu.dynamic_rotate %2 by %c21_i32 dim 0 : vector<64x96xf32>, i32 -> vector<64x96xf32>
    %c0_4 = arith.constant 0 : index
    %c0_5 = arith.constant 0 : index
    %c0_6 = arith.constant 0 : index
    %7 = vector.load %arg2[%c0_4, %c0_5, %c0_6] : memref<27x64x96xf32, #tpu.memory_space<vmem>>, vector<1x64x96xf32>
    %8 = vector.shape_cast %7 : vector<1x64x96xf32> to vector<64x96xf32>
    %9 = arith.mulf %6, %8 : vector<64x96xf32>
    %10 = arith.addf %5, %9 : vector<64x96xf32>
    %c20_i32 = arith.constant 20 : i32
    %11 = tpu.dynamic_rotate %2 by %c20_i32 dim 0 : vector<64x96xf32>, i32 -> vector<64x96xf32>
    %c1 = arith.constant 1 : index
    %c0_7 = arith.constant 0 : index
    %c0_8 = arith.constant 0 : index
    %12 = vector.load %arg2[%c1, %c0_7, %c0_8] : memref<27x64x96xf32, #tpu.memory_space<vmem>>, vector<1x64x96xf32>
    %13 = vector.shape_cast %12 : vector<1x64x96xf32> to vector<64x96xf32>
    %14 = arith.mulf %11, %13 : vector<64x96xf32>
    %15 = arith.addf %10, %14 : vector<64x96xf32>
    %c19_i32 = arith.constant 19 : i32
    %16 = tpu.dynamic_rotate %2 by %c19_i32 dim 0 : vector<64x96xf32>, i32 -> vector<64x96xf32>
    %c2 = arith.constant 2 : index
    %c0_9 = arith.constant 0 : index
    %c0_10 = arith.constant 0 : index
    %17 = vector.load %arg2[%c2, %c0_9, %c0_10] : memref<27x64x96xf32, #tpu.memory_space<vmem>>, vector<1x64x96xf32>
    %18 = vector.shape_cast %17 : vector<1x64x96xf32> to vector<64x96xf32>
    %19 = arith.mulf %16, %18 : vector<64x96xf32>
    %20 = arith.addf %15, %19 : vector<64x96xf32>
    %c17_i32 = arith.constant 17 : i32
    %21 = tpu.dynamic_rotate %2 by %c17_i32 dim 0 : vector<64x96xf32>, i32 -> vector<64x96xf32>
    %c3 = arith.constant 3 : index
    %c0_11 = arith.constant 0 : index
    %c0_12 = arith.constant 0 : index
    %22 = vector.load %arg2[%c3, %c0_11, %c0_12] : memref<27x64x96xf32, #tpu.memory_space<vmem>>, vector<1x64x96xf32>
    %23 = vector.shape_cast %22 : vector<1x64x96xf32> to vector<64x96xf32>
    %24 = arith.mulf %21, %23 : vector<64x96xf32>
    %25 = arith.addf %20, %24 : vector<64x96xf32>
    %c16_i32 = arith.constant 16 : i32
    %26 = tpu.dynamic_rotate %2 by %c16_i32 dim 0 : vector<64x96xf32>, i32 -> vector<64x96xf32>
    %c4 = arith.constant 4 : index
    %c0_13 = arith.constant 0 : index
    %c0_14 = arith.constant 0 : index
    %27 = vector.load %arg2[%c4, %c0_13, %c0_14] : memref<27x64x96xf32, #tpu.memory_space<vmem>>, vector<1x64x96xf32>
    %28 = vector.shape_cast %27 : vector<1x64x96xf32> to vector<64x96xf32>
    %29 = arith.mulf %26, %28 : vector<64x96xf32>
    %30 = arith.addf %25, %29 : vector<64x96xf32>
    %c15_i32 = arith.constant 15 : i32
    %31 = tpu.dynamic_rotate %2 by %c15_i32 dim 0 : vector<64x96xf32>, i32 -> vector<64x96xf32>
    %c5 = arith.constant 5 : index
    %c0_15 = arith.constant 0 : index
    %c0_16 = arith.constant 0 : index
    %32 = vector.load %arg2[%c5, %c0_15, %c0_16] : memref<27x64x96xf32, #tpu.memory_space<vmem>>, vector<1x64x96xf32>
    %33 = vector.shape_cast %32 : vector<1x64x96xf32> to vector<64x96xf32>
    %34 = arith.mulf %31, %33 : vector<64x96xf32>
    %35 = arith.addf %30, %34 : vector<64x96xf32>
    %c13_i32 = arith.constant 13 : i32
    %36 = tpu.dynamic_rotate %2 by %c13_i32 dim 0 : vector<64x96xf32>, i32 -> vector<64x96xf32>
    %c6 = arith.constant 6 : index
    %c0_17 = arith.constant 0 : index
    %c0_18 = arith.constant 0 : index
    %37 = vector.load %arg2[%c6, %c0_17, %c0_18] : memref<27x64x96xf32, #tpu.memory_space<vmem>>, vector<1x64x96xf32>
    %38 = vector.shape_cast %37 : vector<1x64x96xf32> to vector<64x96xf32>
    %39 = arith.mulf %36, %38 : vector<64x96xf32>
    %40 = arith.addf %35, %39 : vector<64x96xf32>
    %c12_i32 = arith.constant 12 : i32
    %41 = tpu.dynamic_rotate %2 by %c12_i32 dim 0 : vector<64x96xf32>, i32 -> vector<64x96xf32>
    %c7 = arith.constant 7 : index
    %c0_19 = arith.constant 0 : index
    %c0_20 = arith.constant 0 : index
    %42 = vector.load %arg2[%c7, %c0_19, %c0_20] : memref<27x64x96xf32, #tpu.memory_space<vmem>>, vector<1x64x96xf32>
    %43 = vector.shape_cast %42 : vector<1x64x96xf32> to vector<64x96xf32>
    %44 = arith.mulf %41, %43 : vector<64x96xf32>
    %45 = arith.addf %40, %44 : vector<64x96xf32>
    %c11_i32 = arith.constant 11 : i32
    %46 = tpu.dynamic_rotate %2 by %c11_i32 dim 0 : vector<64x96xf32>, i32 -> vector<64x96xf32>
    %c8 = arith.constant 8 : index
    %c0_21 = arith.constant 0 : index
    %c0_22 = arith.constant 0 : index
    %47 = vector.load %arg2[%c8, %c0_21, %c0_22] : memref<27x64x96xf32, #tpu.memory_space<vmem>>, vector<1x64x96xf32>
    %48 = vector.shape_cast %47 : vector<1x64x96xf32> to vector<64x96xf32>
    %49 = arith.mulf %46, %48 : vector<64x96xf32>
    %50 = arith.addf %45, %49 : vector<64x96xf32>
    %c5_i32 = arith.constant 5 : i32
    %51 = tpu.dynamic_rotate %2 by %c5_i32 dim 0 : vector<64x96xf32>, i32 -> vector<64x96xf32>
    %c9 = arith.constant 9 : index
    %c0_23 = arith.constant 0 : index
    %c0_24 = arith.constant 0 : index
    %52 = vector.load %arg2[%c9, %c0_23, %c0_24] : memref<27x64x96xf32, #tpu.memory_space<vmem>>, vector<1x64x96xf32>
    %53 = vector.shape_cast %52 : vector<1x64x96xf32> to vector<64x96xf32>
    %54 = arith.mulf %51, %53 : vector<64x96xf32>
    %55 = arith.addf %50, %54 : vector<64x96xf32>
    %c4_i32 = arith.constant 4 : i32
    %56 = tpu.dynamic_rotate %2 by %c4_i32 dim 0 : vector<64x96xf32>, i32 -> vector<64x96xf32>
    %c10 = arith.constant 10 : index
    %c0_25 = arith.constant 0 : index
    %c0_26 = arith.constant 0 : index
    %57 = vector.load %arg2[%c10, %c0_25, %c0_26] : memref<27x64x96xf32, #tpu.memory_space<vmem>>, vector<1x64x96xf32>
    %58 = vector.shape_cast %57 : vector<1x64x96xf32> to vector<64x96xf32>
    %59 = arith.mulf %56, %58 : vector<64x96xf32>
    %60 = arith.addf %55, %59 : vector<64x96xf32>
    %c3_i32 = arith.constant 3 : i32
    %61 = tpu.dynamic_rotate %2 by %c3_i32 dim 0 : vector<64x96xf32>, i32 -> vector<64x96xf32>
    %c11 = arith.constant 11 : index
    %c0_27 = arith.constant 0 : index
    %c0_28 = arith.constant 0 : index
    %62 = vector.load %arg2[%c11, %c0_27, %c0_28] : memref<27x64x96xf32, #tpu.memory_space<vmem>>, vector<1x64x96xf32>
    %63 = vector.shape_cast %62 : vector<1x64x96xf32> to vector<64x96xf32>
    %64 = arith.mulf %61, %63 : vector<64x96xf32>
    %65 = arith.addf %60, %64 : vector<64x96xf32>
    %c1_i32 = arith.constant 1 : i32
    %66 = tpu.dynamic_rotate %2 by %c1_i32 dim 0 : vector<64x96xf32>, i32 -> vector<64x96xf32>
    %c12 = arith.constant 12 : index
    %c0_29 = arith.constant 0 : index
    %c0_30 = arith.constant 0 : index
    %67 = vector.load %arg2[%c12, %c0_29, %c0_30] : memref<27x64x96xf32, #tpu.memory_space<vmem>>, vector<1x64x96xf32>
    %68 = vector.shape_cast %67 : vector<1x64x96xf32> to vector<64x96xf32>
    %69 = arith.mulf %66, %68 : vector<64x96xf32>
    %70 = arith.addf %65, %69 : vector<64x96xf32>
    %c63_i32 = arith.constant 63 : i32
    %71 = tpu.dynamic_rotate %2 by %c63_i32 dim 0 : vector<64x96xf32>, i32 -> vector<64x96xf32>
    %c14 = arith.constant 14 : index
    %c0_31 = arith.constant 0 : index
    %c0_32 = arith.constant 0 : index
    %72 = vector.load %arg2[%c14, %c0_31, %c0_32] : memref<27x64x96xf32, #tpu.memory_space<vmem>>, vector<1x64x96xf32>
    %73 = vector.shape_cast %72 : vector<1x64x96xf32> to vector<64x96xf32>
    %74 = arith.mulf %71, %73 : vector<64x96xf32>
    %75 = arith.addf %70, %74 : vector<64x96xf32>
    %c61_i32 = arith.constant 61 : i32
    %76 = tpu.dynamic_rotate %2 by %c61_i32 dim 0 : vector<64x96xf32>, i32 -> vector<64x96xf32>
    %c15 = arith.constant 15 : index
    %c0_33 = arith.constant 0 : index
    %c0_34 = arith.constant 0 : index
    %77 = vector.load %arg2[%c15, %c0_33, %c0_34] : memref<27x64x96xf32, #tpu.memory_space<vmem>>, vector<1x64x96xf32>
    %78 = vector.shape_cast %77 : vector<1x64x96xf32> to vector<64x96xf32>
    %79 = arith.mulf %76, %78 : vector<64x96xf32>
    %80 = arith.addf %75, %79 : vector<64x96xf32>
    %c60_i32 = arith.constant 60 : i32
    %81 = tpu.dynamic_rotate %2 by %c60_i32 dim 0 : vector<64x96xf32>, i32 -> vector<64x96xf32>
    %c16 = arith.constant 16 : index
    %c0_35 = arith.constant 0 : index
    %c0_36 = arith.constant 0 : index
    %82 = vector.load %arg2[%c16, %c0_35, %c0_36] : memref<27x64x96xf32, #tpu.memory_space<vmem>>, vector<1x64x96xf32>
    %83 = vector.shape_cast %82 : vector<1x64x96xf32> to vector<64x96xf32>
    %84 = arith.mulf %81, %83 : vector<64x96xf32>
    %85 = arith.addf %80, %84 : vector<64x96xf32>
    %c59_i32 = arith.constant 59 : i32
    %86 = tpu.dynamic_rotate %2 by %c59_i32 dim 0 : vector<64x96xf32>, i32 -> vector<64x96xf32>
    %c17 = arith.constant 17 : index
    %c0_37 = arith.constant 0 : index
    %c0_38 = arith.constant 0 : index
    %87 = vector.load %arg2[%c17, %c0_37, %c0_38] : memref<27x64x96xf32, #tpu.memory_space<vmem>>, vector<1x64x96xf32>
    %88 = vector.shape_cast %87 : vector<1x64x96xf32> to vector<64x96xf32>
    %89 = arith.mulf %86, %88 : vector<64x96xf32>
    %90 = arith.addf %85, %89 : vector<64x96xf32>
    %c53_i32 = arith.constant 53 : i32
    %91 = tpu.dynamic_rotate %2 by %c53_i32 dim 0 : vector<64x96xf32>, i32 -> vector<64x96xf32>
    %c18 = arith.constant 18 : index
    %c0_39 = arith.constant 0 : index
    %c0_40 = arith.constant 0 : index
    %92 = vector.load %arg2[%c18, %c0_39, %c0_40] : memref<27x64x96xf32, #tpu.memory_space<vmem>>, vector<1x64x96xf32>
    %93 = vector.shape_cast %92 : vector<1x64x96xf32> to vector<64x96xf32>
    %94 = arith.mulf %91, %93 : vector<64x96xf32>
    %95 = arith.addf %90, %94 : vector<64x96xf32>
    %c52_i32 = arith.constant 52 : i32
    %96 = tpu.dynamic_rotate %2 by %c52_i32 dim 0 : vector<64x96xf32>, i32 -> vector<64x96xf32>
    %c19 = arith.constant 19 : index
    %c0_41 = arith.constant 0 : index
    %c0_42 = arith.constant 0 : index
    %97 = vector.load %arg2[%c19, %c0_41, %c0_42] : memref<27x64x96xf32, #tpu.memory_space<vmem>>, vector<1x64x96xf32>
    %98 = vector.shape_cast %97 : vector<1x64x96xf32> to vector<64x96xf32>
    %99 = arith.mulf %96, %98 : vector<64x96xf32>
    %100 = arith.addf %95, %99 : vector<64x96xf32>
    %c51_i32 = arith.constant 51 : i32
    %101 = tpu.dynamic_rotate %2 by %c51_i32 dim 0 : vector<64x96xf32>, i32 -> vector<64x96xf32>
    %c20 = arith.constant 20 : index
    %c0_43 = arith.constant 0 : index
    %c0_44 = arith.constant 0 : index
    %102 = vector.load %arg2[%c20, %c0_43, %c0_44] : memref<27x64x96xf32, #tpu.memory_space<vmem>>, vector<1x64x96xf32>
    %103 = vector.shape_cast %102 : vector<1x64x96xf32> to vector<64x96xf32>
    %104 = arith.mulf %101, %103 : vector<64x96xf32>
    %105 = arith.addf %100, %104 : vector<64x96xf32>
    %c49_i32 = arith.constant 49 : i32
    %106 = tpu.dynamic_rotate %2 by %c49_i32 dim 0 : vector<64x96xf32>, i32 -> vector<64x96xf32>
    %c21 = arith.constant 21 : index
    %c0_45 = arith.constant 0 : index
    %c0_46 = arith.constant 0 : index
    %107 = vector.load %arg2[%c21, %c0_45, %c0_46] : memref<27x64x96xf32, #tpu.memory_space<vmem>>, vector<1x64x96xf32>
    %108 = vector.shape_cast %107 : vector<1x64x96xf32> to vector<64x96xf32>
    %109 = arith.mulf %106, %108 : vector<64x96xf32>
    %110 = arith.addf %105, %109 : vector<64x96xf32>
    %c48_i32 = arith.constant 48 : i32
    %111 = tpu.dynamic_rotate %2 by %c48_i32 dim 0 : vector<64x96xf32>, i32 -> vector<64x96xf32>
    %c22 = arith.constant 22 : index
    %c0_47 = arith.constant 0 : index
    %c0_48 = arith.constant 0 : index
    %112 = vector.load %arg2[%c22, %c0_47, %c0_48] : memref<27x64x96xf32, #tpu.memory_space<vmem>>, vector<1x64x96xf32>
    %113 = vector.shape_cast %112 : vector<1x64x96xf32> to vector<64x96xf32>
    %114 = arith.mulf %111, %113 : vector<64x96xf32>
    %115 = arith.addf %110, %114 : vector<64x96xf32>
    %c47_i32 = arith.constant 47 : i32
    %116 = tpu.dynamic_rotate %2 by %c47_i32 dim 0 : vector<64x96xf32>, i32 -> vector<64x96xf32>
    %c23 = arith.constant 23 : index
    %c0_49 = arith.constant 0 : index
    %c0_50 = arith.constant 0 : index
    %117 = vector.load %arg2[%c23, %c0_49, %c0_50] : memref<27x64x96xf32, #tpu.memory_space<vmem>>, vector<1x64x96xf32>
    %118 = vector.shape_cast %117 : vector<1x64x96xf32> to vector<64x96xf32>
    %119 = arith.mulf %116, %118 : vector<64x96xf32>
    %120 = arith.addf %115, %119 : vector<64x96xf32>
    %c45_i32 = arith.constant 45 : i32
    %121 = tpu.dynamic_rotate %2 by %c45_i32 dim 0 : vector<64x96xf32>, i32 -> vector<64x96xf32>
    %c24 = arith.constant 24 : index
    %c0_51 = arith.constant 0 : index
    %c0_52 = arith.constant 0 : index
    %122 = vector.load %arg2[%c24, %c0_51, %c0_52] : memref<27x64x96xf32, #tpu.memory_space<vmem>>, vector<1x64x96xf32>
    %123 = vector.shape_cast %122 : vector<1x64x96xf32> to vector<64x96xf32>
    %124 = arith.mulf %121, %123 : vector<64x96xf32>
    %125 = arith.addf %120, %124 : vector<64x96xf32>
    %c44_i32 = arith.constant 44 : i32
    %126 = tpu.dynamic_rotate %2 by %c44_i32 dim 0 : vector<64x96xf32>, i32 -> vector<64x96xf32>
    %c25 = arith.constant 25 : index
    %c0_53 = arith.constant 0 : index
    %c0_54 = arith.constant 0 : index
    %127 = vector.load %arg2[%c25, %c0_53, %c0_54] : memref<27x64x96xf32, #tpu.memory_space<vmem>>, vector<1x64x96xf32>
    %128 = vector.shape_cast %127 : vector<1x64x96xf32> to vector<64x96xf32>
    %129 = arith.mulf %126, %128 : vector<64x96xf32>
    %130 = arith.addf %125, %129 : vector<64x96xf32>
    %c43_i32 = arith.constant 43 : i32
    %131 = tpu.dynamic_rotate %2 by %c43_i32 dim 0 : vector<64x96xf32>, i32 -> vector<64x96xf32>
    %c26 = arith.constant 26 : index
    %c0_55 = arith.constant 0 : index
    %c0_56 = arith.constant 0 : index
    %132 = vector.load %arg2[%c26, %c0_55, %c0_56] : memref<27x64x96xf32, #tpu.memory_space<vmem>>, vector<1x64x96xf32>
    %133 = vector.shape_cast %132 : vector<1x64x96xf32> to vector<64x96xf32>
    %134 = arith.mulf %131, %133 : vector<64x96xf32>
    %135 = arith.addf %130, %134 : vector<64x96xf32>
    %c0_57 = arith.constant 0 : index
    %c0_58 = arith.constant 0 : index
    %136 = vector.load %arg3[%c0_57, %c0_58] : memref<96x96xf32, #tpu.memory_space<vmem>>, vector<96x96xf32>
    %cst = arith.constant dense<0.000000e+00> : vector<64x96xf32>
    %137 = tpu.matmul %135, %136, %cst {dimension_numbers = #tpu.dot_dimension_numbers<[1], [0], [0], [1], [0, 0, 1, 1], [], []>} : vector<64x96xf32>, vector<96x96xf32>, vector<64x96xf32> -> vector<64x96xf32>
    %c0_59 = arith.constant 0 : index
    %c0_60 = arith.constant 0 : index
    %138 = vector.load %arg4[%c0_59, %c0_60] : memref<1x96xf32, #tpu.memory_space<vmem>>, vector<1x96xf32>
    %139 = vector.broadcast %138 : vector<1x96xf32> to vector<64x96xf32>
    %140 = arith.addf %137, %139 : vector<64x96xf32>
    %141 = vector.extract_strided_slice %140 {offsets = [0, 0], sizes = [64, 32], strides = [1, 1]} : vector<64x96xf32> to vector<64x32xf32>
    %c0_61 = arith.constant 0 : index
    %c0_62 = arith.constant 0 : index
    %142 = vector.load %arg5[%c0_61, %c0_62] : memref<8x64xf32, #tpu.memory_space<vmem>>, vector<8x64xf32>
    %143 = vector.extract_strided_slice %140 {offsets = [0, 32], sizes = [64, 64], strides = [1, 1]} : vector<64x96xf32> to vector<64x64xf32>
    %cst_63 = arith.constant dense<0.000000e+00> : vector<8x64xf32>
    %144 = tpu.matmul %142, %143, %cst_63 {dimension_numbers = #tpu.dot_dimension_numbers<[1], [0], [0], [1], [0, 0, 1, 1], [], []>} : vector<8x64xf32>, vector<64x64xf32>, vector<8x64xf32> -> vector<8x64xf32>
    %145 = vector.extract_strided_slice %144 {offsets = [0, 0], sizes = [8, 32], strides = [1, 1]} : vector<8x64xf32> to vector<8x32xf32>
    %146 = vector.extract_strided_slice %144 {offsets = [0, 32], sizes = [8, 32], strides = [1, 1]} : vector<8x64xf32> to vector<8x32xf32>
    %c0_64 = arith.constant 0 : index
    %c0_65 = arith.constant 0 : index
    %147 = vector.load %arg6[%c0_64, %c0_65] : memref<32x32xf32, #tpu.memory_space<vmem>>, vector<32x32xf32>
    %148 = tpu.concatenate %145, %145, %145, %145 in 0 : vector<8x32xf32>, vector<8x32xf32>, vector<8x32xf32>, vector<8x32xf32> -> vector<32x32xf32>
    %149 = arith.mulf %148, %147 : vector<32x32xf32>
    %150 = tpu.concatenate %146, %146, %146, %146 in 0 : vector<8x32xf32>, vector<8x32xf32>, vector<8x32xf32>, vector<8x32xf32> -> vector<32x32xf32>
    %151 = arith.mulf %150, %147 : vector<32x32xf32>
    %cst_66 = arith.constant dense<0.000000e+00> : vector<64x32xf32>
    %152 = tpu.matmul %141, %149, %cst_66 {dimension_numbers = #tpu.dot_dimension_numbers<[1], [1], [0], [0], [0, 0, 1, 0], [], []>} : vector<64x32xf32>, vector<32x32xf32>, vector<64x32xf32> -> vector<64x32xf32>
    %153 = vector.extract_strided_slice %152 {offsets = [0, 0], sizes = [64, 8], strides = [1, 1]} : vector<64x32xf32> to vector<64x8xf32>
    %cst_67 = arith.constant dense<0xFF800000> : vector<64xf32>
    %154 = vector.multi_reduction <maximumf>, %153, %cst_67 [1] : vector<64x8xf32> to vector<64xf32>
    %155 = vector.shape_cast %154 : vector<64xf32> to vector<64x1xf32>
    %156 = vector.shape_cast %155 : vector<64x1xf32> to vector<64x1xf32>
    %157 = vector.broadcast %156 : vector<64x1xf32> to vector<64x8xf32>
    %158 = vector.extract_strided_slice %152 {offsets = [0, 8], sizes = [64, 8], strides = [1, 1]} : vector<64x32xf32> to vector<64x8xf32>
    %cst_68 = arith.constant dense<0xFF800000> : vector<64xf32>
    %159 = vector.multi_reduction <maximumf>, %158, %cst_68 [1] : vector<64x8xf32> to vector<64xf32>
    %160 = vector.shape_cast %159 : vector<64xf32> to vector<64x1xf32>
    %161 = vector.shape_cast %160 : vector<64x1xf32> to vector<64x1xf32>
    %162 = vector.broadcast %161 : vector<64x1xf32> to vector<64x8xf32>
    %163 = vector.extract_strided_slice %152 {offsets = [0, 16], sizes = [64, 8], strides = [1, 1]} : vector<64x32xf32> to vector<64x8xf32>
    %cst_69 = arith.constant dense<0xFF800000> : vector<64xf32>
    %164 = vector.multi_reduction <maximumf>, %163, %cst_69 [1] : vector<64x8xf32> to vector<64xf32>
    %165 = vector.shape_cast %164 : vector<64xf32> to vector<64x1xf32>
    %166 = vector.shape_cast %165 : vector<64x1xf32> to vector<64x1xf32>
    %167 = vector.broadcast %166 : vector<64x1xf32> to vector<64x8xf32>
    %168 = vector.extract_strided_slice %152 {offsets = [0, 24], sizes = [64, 8], strides = [1, 1]} : vector<64x32xf32> to vector<64x8xf32>
    %cst_70 = arith.constant dense<0xFF800000> : vector<64xf32>
    %169 = vector.multi_reduction <maximumf>, %168, %cst_70 [1] : vector<64x8xf32> to vector<64xf32>
    %170 = vector.shape_cast %169 : vector<64xf32> to vector<64x1xf32>
    %171 = vector.shape_cast %170 : vector<64x1xf32> to vector<64x1xf32>
    %172 = vector.broadcast %171 : vector<64x1xf32> to vector<64x8xf32>
    %173 = tpu.concatenate %157, %162, %167, %172 in 1 : vector<64x8xf32>, vector<64x8xf32>, vector<64x8xf32>, vector<64x8xf32> -> vector<64x32xf32>
    %174 = arith.subf %152, %173 : vector<64x32xf32>
    %175 = math.exp %174 : vector<64x32xf32>
    %c0_71 = arith.constant 0 : index
    %c0_72 = arith.constant 0 : index
    %176 = vector.load %arg7[%c0_71, %c0_72] : memref<32x32xf32, #tpu.memory_space<vmem>>, vector<32x32xf32>
    %cst_73 = arith.constant dense<0.000000e+00> : vector<64x32xf32>
    %177 = tpu.matmul %175, %176, %cst_73 {dimension_numbers = #tpu.dot_dimension_numbers<[1], [0], [0], [1], [0, 0, 1, 1], [], []>} : vector<64x32xf32>, vector<32x32xf32>, vector<64x32xf32> -> vector<64x32xf32>
    %178 = arith.divf %175, %177 : vector<64x32xf32>
    %cst_74 = arith.constant dense<0.000000e+00> : vector<64x32xf32>
    %179 = tpu.matmul %178, %151, %cst_74 {dimension_numbers = #tpu.dot_dimension_numbers<[1], [0], [0], [1], [0, 0, 1, 1], [], []>} : vector<64x32xf32>, vector<32x32xf32>, vector<64x32xf32> -> vector<64x32xf32>
    %c0_75 = arith.constant 0 : index
    %c0_76 = arith.constant 0 : index
    %180 = vector.load %arg8[%c0_75, %c0_76] : memref<32x32xf32, #tpu.memory_space<vmem>>, vector<32x32xf32>
    %cst_77 = arith.constant dense<0.000000e+00> : vector<64x32xf32>
    %181 = tpu.matmul %179, %180, %cst_77 {dimension_numbers = #tpu.dot_dimension_numbers<[1], [0], [0], [1], [0, 0, 1, 1], [], []>} : vector<64x32xf32>, vector<32x32xf32>, vector<64x32xf32> -> vector<64x32xf32>
    %c0_78 = arith.constant 0 : index
    %c0_79 = arith.constant 0 : index
    %182 = vector.load %arg9[%c0_78, %c0_79] : memref<1x32xf32, #tpu.memory_space<vmem>>, vector<1x32xf32>
    %183 = vector.broadcast %182 : vector<1x32xf32> to vector<64x32xf32>
    %184 = arith.addf %181, %183 : vector<64x32xf32>
    %c0_80 = arith.constant 0 : index
    %c0_81 = arith.constant 0 : index
    %c0_82 = arith.constant 0 : index
    %185 = vector.load %arg10[%c0_80, %c0_81, %c0_82] : memref<1x64x32xf32, #tpu.memory_space<vmem>>, vector<1x64x32xf32>
    %186 = vector.shape_cast %185 : vector<1x64x32xf32> to vector<64x32xf32>
    %187 = vector.shape_cast %184 : vector<64x32xf32> to vector<1x64x32xf32>
    tpu.vector_store %arg10[%c0_80, %c0_81, %c0_82], %187 {strides = array<i32>} : memref<1x64x32xf32, #tpu.memory_space<vmem>>, vector<1x64x32xf32>,
    return
  }
  func.func @transform_0(%arg0: i32) -> (i32, i32, i32) {
    %c0_i32 = arith.constant 0 : i32
    %c0_i32_0 = arith.constant 0 : i32
    %c0_i32_1 = arith.constant 0 : i32
    return %arg0, %c0_i32, %c0_i32_0 : i32, i32, i32
  }
  func.func @transform_1(%arg0: i32) -> (i32, i32, i32) {
    %c0_i32 = arith.constant 0 : i32
    %c0_i32_0 = arith.constant 0 : i32
    %c0_i32_1 = arith.constant 0 : i32
    %c0_i32_2 = arith.constant 0 : i32
    return %c0_i32, %c0_i32_0, %c0_i32_1 : i32, i32, i32
  }
  func.func @transform_2(%arg0: i32) -> (i32, i32) {
    %c0_i32 = arith.constant 0 : i32
    %c0_i32_0 = arith.constant 0 : i32
    %c0_i32_1 = arith.constant 0 : i32
    return %c0_i32, %c0_i32_0 : i32, i32
  }
  func.func @transform_3(%arg0: i32) -> (i32, i32) {
    %c0_i32 = arith.constant 0 : i32
    %c0_i32_0 = arith.constant 0 : i32
    %c0_i32_1 = arith.constant 0 : i32
    return %c0_i32, %c0_i32_0 : i32, i32
  }
  func.func @transform_4(%arg0: i32) -> (i32, i32) {
    %c0_i32 = arith.constant 0 : i32
    %c0_i32_0 = arith.constant 0 : i32
    %c0_i32_1 = arith.constant 0 : i32
    return %c0_i32, %c0_i32_0 : i32, i32
  }
  func.func @transform_5(%arg0: i32) -> (i32, i32) {
    %c0_i32 = arith.constant 0 : i32
    %c0_i32_0 = arith.constant 0 : i32
    %c0_i32_1 = arith.constant 0 : i32
    return %c0_i32, %c0_i32_0 : i32, i32
  }
  func.func @transform_6(%arg0: i32) -> (i32, i32) {
    %c0_i32 = arith.constant 0 : i32
    %c0_i32_0 = arith.constant 0 : i32
    %c0_i32_1 = arith.constant 0 : i32
    return %c0_i32, %c0_i32_0 : i32, i32
  }
  func.func @transform_7(%arg0: i32) -> (i32, i32) {
    %c0_i32 = arith.constant 0 : i32
    %c0_i32_0 = arith.constant 0 : i32
    %c0_i32_1 = arith.constant 0 : i32
    return %c0_i32, %c0_i32_0 : i32, i32
  }
  func.func @transform_8(%arg0: i32) -> (i32, i32) {
    %c0_i32 = arith.constant 0 : i32
    %c0_i32_0 = arith.constant 0 : i32
    %c0_i32_1 = arith.constant 0 : i32
    return %c0_i32, %c0_i32_0 : i32, i32
  }
  func.func @transform_9(%arg0: i32) -> (i32, i32, i32) {
    %c0_i32 = arith.constant 0 : i32
    %c0_i32_0 = arith.constant 0 : i32
    %c0_i32_1 = arith.constant 0 : i32
    return %arg0, %c0_i32, %c0_i32_0 : i32, i32, i32
  }
}

</mosaic_0001>

<bundles_post_ra>
// kernel: tpu_custom_call.1
= control target key start
LH: loop header
LB: loop body
LE: loop exit
PB: predicated region body
PF: predicated region fallthrough
CT: control target
= control target key end

     0   :  { %14 = vsyncpa [#allocation3], 0  ;;  %s3884_s0 = inlined_call_operand.vmem [shape: f32[2,64,32], index: 0, kind: input, shape index: {}]   ;;  %s3885_s1 = inlined_call_operand.hbm [shape: f32[27,64,96], index: 1, kind: input, shape index: {}]   ;;  %s3886_s2 = inlined_call_operand.vmem [shape: f32[96,96], index: 2, kind: input, shape index: {}]   ;;  %s3887_s3 = inlined_call_operand.vmem [shape: f32[1,96], index: 3, kind: input, shape index: {}]   ;;  %s3888_s4 = inlined_call_operand.hbm [shape: f32[8,64], index: 4, kind: input, shape index: {}]   ;;  %s3889_s5 = inlined_call_operand.vmem [shape: f32[32,32], index: 5, kind: input, shape index: {}]   ;;  %s3890_s6 = inlined_call_operand.vmem [shape: f32[32,32], index: 6, kind: input, shape index: {}]   ;;  %s3891_s7 = inlined_call_operand.vmem [shape: f32[32,32], index: 7, kind: input, shape index: {}]   ;;  %s3892_s8 = inlined_call_operand.vmem [shape: f32[1,32], index: 8, kind: input, shape index: {}]   ;;  %s3893_s9 = inlined_call_operand.vmem [shape: f32[2,64,32], index: 9, kind: output, shape index: {}]  }
   0x1   :  { %15 = vsyncpa [#allocation5], 0  ;;  %s2760_s30 = smov 0  }
   0x2 LB: > { %s2766_s10 = sadd.s32 4294967295, %s2699_s30   ;;  %p2283_p0 = scmp.ge.s32.totalorder %s2699_s30, 1  ;;  %s2699_s30 = sphi %s2760_s30, %s21_s30  }
   0x3   : > { %p246_p1 = scmp.lt.s32.totalorder %s2699_s30, 3  ;;  %s2701_s11 = smov [#allocation2]  }
   0x4   : > { %s258_s12 = sshll.u32 %s2701_s11, 4  ;;  %p2580_p3 = scmp.eq.s32.totalorder %s2766_s10, 0  ;;  %s259_s12 = int_to_ptr.vmem [resolvable:$true] %s258_s12 }
   0x5   : > { %p2770_p2 = pnand %p2283_p0, %p246_p1  ;;  %s2702_s14 = smov [#allocation4]  }
   0x6   : > { %s278_s15 = sshll.u32 %s2702_s14, 4  ;;  %s2644_s17 = scalar_lea.vmem %s259_s12, 27648  ;;  %s279_s15 = int_to_ptr.vmem [resolvable:$true] %s278_s15 }
   0x7   : > { %p2573_p4 = pneg %p2770_p2  ;;  %p2645_p7 = scmp.ne.s32.totalorder %s259_s12, %s2644_s17 }
   0x8   : > { %p2652_p10 = scmp.lt.s32.totalorder %s259_s12, %s259_s12  ;;  %p2653_p11 = scmp.lt.s32.totalorder %s2644_s17, %s2644_s17 }
   0x9   : > { %p2779_p5 = pnand %p2580_p3, %p2573_p4 }
   0xa   : > { %p2654_p12 = por %p2653_p11, %p2652_p10 }
   0xb   : > { %p2635_p6 = pneg %p2779_p5 }
   0xd   : > { %p2647_p8 = pnand %p2645_p7, %p2635_p6 }
   0xf   : > { %p2648_p9 = pneg %p2647_p8 }
  0x11   : > { %p2655_p13 = pnand %p2654_p12, %p2648_p9 }
  0x13   : > { %2658 = shalt.err (!%p2655_p13)
}
  0x14   : > { %s2703_s18 = smov 128   ;;  %s2704_s19 = smov 8  }
  0x15   : > { %2576 = dma.hbm_to_vmem [thread:$0]  (!%p2779_p5), %s3885_s1, 27648, %s259_s12, [#allocation3], %s2703_s18, %s2703_s18, %s2704_s19  }
  0x16   : > { %s2670_s22 = scalar_lea.vmem %s279_s15, 128  ;;  %p2678_p7 = scmp.lt.s32.totalorder %s279_s15, %s279_s15 }
  0x17   : > { %p2671_p0 = scmp.ne.s32.totalorder %s279_s15, %s2670_s22  ;;  %p2679_p8 = scmp.lt.s32.totalorder %s2670_s22, %s2670_s22 }
  0x19   : > { %p2673_p1 = pnand %p2671_p0, %p2635_p6  ;;  %p2680_p10 = por %p2679_p8, %p2678_p7 }
  0x1b   : > { %p2674_p4 = pneg %p2673_p1 }
  0x1d   : > { %p2681_p9 = pnand %p2680_p10, %p2674_p4 }
  0x1f   : > { %2684 = shalt.err (!%p2681_p9)
}
  0x20   : > { %2579 = dma.hbm_to_vmem [thread:$0]  (!%p2779_p5), %s3888_s4, 128, %s279_s15, [#allocation5]  }
  0x21   : > { %311 = sbr.rel (%p2770_p2) target bundleno = 1875 (0x753), region = 56 }
  0x26   : > { %2690 = dma.done.wait (%p2580_p3), [#allocation3], 27648  }
  0x27   : > { %2692 = vsyncadd (%p2580_p3), [#allocation3], 4294939648 }
  0x28   : > { %2694 = dma.done.wait (%p2580_p3), [#allocation5], 128  }
  0x29   : > { %2696 = vsyncadd (%p2580_p3), [#allocation5], 4294967168  ;;  %p351_p6 = scmp.lt.s32.totalorder %s2766_s10, 1  ;;  %s2705_s29 = smov 32   ;;  %v1207_v8 = vld [vmem:[%s3886_s2 + $0x58] sm:$0xff]  ;;  %v1206_v9 = vld [vmem:[%s3886_s2 + $0x50] sm:$0xff]  ;;  %v468_v22 = vlaneseq }
  0x2a   : > { %s2706_s11 = smov 64   ;;  %2422 = vmatprep.subr.mxu0 %v1207_v8  ;;  %v1205_v10 = vld [vmem:[%s3886_s2 + $0x48] sm:$0xff]  ;;  %v1204_v11 = vld [vmem:[%s3886_s2 + $0x40] sm:$0xff]  ;;  %v1203_v12 = vld [vmem:[%s3886_s2 + $0x38] sm:$0xff]  ;;  %vm425_vm0 = vcmask 261120   ;;  %vm434_vm1 = vcmask 523264  }
  0x2b   : > { %s4034_s10 = smov (!%p351_p6, %s2766_s10), 1  ;;  %2423 = vmatpush3.msra.mxu0 %v1207_v8  ;;  %v1202_v13 = vld [vmem:[%s3886_s2 + $0x30] sm:$0xff]  ;;  %v1201_v14 = vld [vmem:[%s3886_s2 + $0x28] sm:$0xff]  ;;  %v1200_v15 = vld [vmem:[%s3886_s2 + $0x20] sm:$0xff]  ;;  %v2897_v25 = vshrl.u32 %v468_v22, 7  ;;  %vm1215_vm7 = vcmask 785408  }
  0x2c   : > { %s2343_s25 = sshll.u32 %s4034_s10, 6  ;;  %2424 = vmatprep.subr.mxu0 %v1206_v9  ;;  %v1199_v16 = vld [vmem:[%s3886_s2 + $0x18] sm:$0xff]  ;;  %v1198_v17 = vld [vmem:[%s3886_s2 + $0x10] sm:$0xff]  ;;  %v1197_v18 = vld [vmem:[%s3886_s2 + $0x8] sm:$0xff]  ;;  %s2708_s21 = smov 96   ;;  %vm2709_vm8 = vmmov 0  }
  0x2d   : > { %s355_s28 = scalar_lea.vmem %s3884_s0, %s2343_s25  ;;  %2425 = vmatpush3.msra.mxu0 %v1206_v9  ;;  %v1196_v19 = vld [vmem:[%s3886_s2] sm:$0xff]  ;;  %v449_v30 = vld [vmem:[#allocation2 + $0x368] sm:$0xff]  ;;  %vm470_vm2 = vcmp.lt.s32.totalorder %v2897_v25, 5  ;;  %vm511_vm3 = vcmp.lt.s32.totalorder %v2897_v25, 4  ;;  %vm553_vm4 = vcmp.lt.s32.totalorder %v2897_v25, 3  ;;  %vm595_vm5 = vcmp.lt.s32.totalorder %v2897_v25, 1  ;;  %s360_s15 = scalar_lea.vmem %s3893_s9, %s2343_s25 }
  0x2e   : > { %v2821_v0 = vld [vmem:[%s355_s28 + $0x38] sm:$0xff]  ;;  %v2823_v1 = vld [vmem:[%s355_s28 + $0x28] sm:$0xff]  ;;  %v2829_v2 = vld [vmem:[%s355_s28 + $0x30] sm:$0xff]  ;;  %2426 = vmatprep.subr.mxu0 %v1205_v10  ;;  %vm662_vm6 = vcmp.lt.s32.totalorder %v2897_v25, 7  ;;  %vm1612_vm9 = vcmask 64512   ;;  %vm1637_vm10 = vcmask 130112  }
  0x2f   : > { %391 = vrot.lane.b32.xlu1 %v2821_v0, %s2705_s29  ;;  %387 = vrot.lane.b32.xlu0 %v2823_v1, %s2705_s29  ;;  %v2836_v3 = vld [vmem:[%s355_s28 + $0x8] sm:$0xff]  ;;  %v2838_v4 = vld [vmem:[%s355_s28] sm:$0xff]  ;;  %v637_v35 = vld [vmem:[#allocation2 + $0x138] sm:$0xff]  ;;  %vm1662_vm11 = vcmask 195712   ;;  %vm1687_vm12 = vcmask 261312   ;;  %vm1720_vm13 = vcmask 130048  }
  0x30   : > { %v2846_v5 = vld [vmem:[%s355_s28 + $0x18] sm:$0xff]  ;;  %v2848_v6 = vld [vmem:[%s355_s28 + $0x10] sm:$0xff]  ;;  %v2856_v7 = vld [vmem:[%s355_s28 + $0x20] sm:$0xff]  ;;  %2427 = vmatpush3.msra.mxu0 %v1205_v10  ;;  %vm1729_vm14 = vcmask 195584  }
  0x31   : > { %2428 = vmatprep.subr.mxu0 %v1204_v11  ;;  %v451_v38 = vld [vmem:[#allocation2 + $0x378] sm:$0xff]  ;;  %v631_v42 = vld [vmem:[#allocation2 + $0x108] sm:$0xff]  ;;  %v450_v49 = vld [vmem:[#allocation2 + $0x370] sm:$0xff] }
  0x32   : > { %2429 = vmatpush3.msra.mxu0 %v1204_v11  ;;  %v1075_v47 = vld [vmem:[#allocation2 + $0x598] sm:$0xff]  ;;  %v630_v58 = vld [vmem:[#allocation2 + $0x100] sm:$0xff]  ;;  %v607_v59 = vld [vmem:[#allocation2 + $0xd0] sm:$0xff] }
  0x33   : > { %411 = vrot.lane.b32.xlu1 %v2823_v1, %s2706_s11  ;;  %389 = vrot.lane.b32.xlu0 %v2829_v2, %s2705_s29  ;;  %v605_v62 = vld [vmem:[#allocation2 + $0xc0] sm:$0xff] }
  0x34   : > { %2430 = vmatprep.subr.mxu0 %v1203_v12 }
  0x35   : > { %2431 = vmatpush3.msra.mxu0 %v1203_v12  ;;  %v722_v12 = vld [vmem:[#allocation2 + $0x1c0] sm:$0xff] }
  0x36   : > { %2432 = vmatprep.subr.mxu0 %v1202_v13 }
  0x37   : > { %415 = vrot.lane.b32.xlu1 %v2821_v0, %s2706_s11  ;;  %413 = vrot.lane.b32.xlu0 %v2829_v2, %s2706_s11 }
  0x38   : > { %2433 = vmatpush3.msra.mxu0 %v1202_v13  ;;  %v747_v13 = vld [vmem:[#allocation2 + $0x200] sm:$0xff] }
  0x39   : > { %2434 = vmatprep.subr.mxu0 %v1201_v14 }
  0x3a   : > { %2435 = vmatpush3.msra.mxu0 %v1201_v14  ;;  %v778_v14 = vld [vmem:[#allocation2 + $0x270] sm:$0xff] }
  0x3b   : > { %379 = vrot.lane.b32.xlu1 %v2836_v3, %s2705_s29  ;;  %377 = vrot.lane.b32.xlu0 %v2838_v4, %s2705_s29 }
  0x3c   : > { %2436 = vmatprep.subr.mxu0 %v1200_v15 }
  0x3d   : > { %2437 = vmatpush3.msra.mxu0 %v1200_v15 }
  0x3e   : > { %2438 = vmatprep.subr.mxu0 %v1199_v16 }
  0x3f   : > { %403 = vrot.lane.b32.xlu1 %v2836_v3, %s2706_s11  ;;  %401 = vrot.lane.b32.xlu0 %v2838_v4, %s2706_s11 }
  0x40   : > { %2439 = vmatpush3.msra.mxu0 %v1199_v16 }
  0x41   : > { %2440 = vmatprep.subr.mxu0 %v1198_v17 }
  0x42   : > { %2441 = vmatpush3.msra.mxu0 %v1198_v17 }
  0x43   : > { %383 = vrot.lane.b32.xlu1 %v2846_v5, %s2705_s29  ;;  %381 = vrot.lane.b32.xlu0 %v2848_v6, %s2705_s29 }
  0x44   : > { %2442 = vmatprep.subr.mxu0 %v1197_v18 }
  0x45   : > { %2443 = vmatpush3.msra.mxu0 %v1197_v18 }
  0x46   : > { %2444 = vmatprep.subr.mxu0 %v1196_v19 }
  0x47   : > { %407 = vrot.lane.b32.xlu1 %v2846_v5, %s2706_s11  ;;  %405 = vrot.lane.b32.xlu0 %v2848_v6, %s2706_s11 }
  0x48   : > { %2445 = vmatpush3.msra.mxu0 %v1196_v19 }
  0x4b   : > { %385 = vrot.lane.b32.xlu0 %v2856_v7, %s2705_s29  ;;  %409 = vrot.lane.b32.xlu1 %v2856_v7, %s2706_s11 }
  0xa1   : > { %v392_v20 = vpop.permute.xlu1 %391  ;;  %v388_v21 = vpop.permute.xlu0 %387 }
  0xa2   : > { %v433_v26 = vsel %vm425_vm0, %v2821_v0, %v392_v20  ;;  %v431_v27 = vsel %vm425_vm0, %v2823_v1, %v388_v21  ;;  %v606_v0 = vld [vmem:[#allocation2 + $0xc8] sm:$0xff]  ;;  %v672_v1 = vld [vmem:[#allocation2 + $0x140] sm:$0xff]  ;;  %v779_v20 = vld [vmem:[#allocation2 + $0x278] sm:$0xff] }
  0xa5   : > { %v412_v23 = vpop.permute.xlu1 %411  ;;  %v390_v24 = vpop.permute.xlu0 %389 }
  0xa6   : > { %v2904_v31 = vsel %vm434_vm1, %v431_v27, %v412_v23  ;;  %v432_v32 = vsel %vm425_vm0, %v2829_v2, %v390_v24  ;;  %v697_v2 = vld [vmem:[#allocation2 + $0x180] sm:$0xff]  ;;  %v480_v27 = vld [vmem:[#allocation2 + $0x8] sm:$0xff] }
  0xa7   : > { %v2920_v36 = vmul.f32 %v449_v30, %v2904_v31  ;;  %v3898_v37 = vrot.slane %v2904_v31, 3  ;;  %v3897_v54 = vrot.slane %v2904_v31, 4  ;;  %v3896_v55 = vrot.slane %v2904_v31, 5  ;;  %v828_v30 = vld [vmem:[#allocation2 + $0x2f0] sm:$0xff] }
  0xa8   : > { %v3895_v56 = vrot.slane %v2904_v31, 7  ;;  %v2937_v57 = vmul.f32 %v637_v35, %v2904_v31  ;;  %v2947_v63 = vmul.f32 %v1075_v47, %v2904_v31 }
  0xa9   : > { %v416_v28 = vpop.permute.xlu1 %415  ;;  %v414_v29 = vpop.permute.xlu0 %413 }
  0xaa   : > { %v2909_v33 = vsel %vm434_vm1, %v433_v26, %v416_v28  ;;  %v2913_v34 = vsel %vm434_vm1, %v432_v32, %v414_v29  ;;  %3944 = vst [vmem:[#allocation9_spill] sm:$0xff] %v2947_v63  ;;  %v445_v26 = vld [vmem:[#allocation2 + $0x348] sm:$0xff]  ;;  %v803_v28 = vld [vmem:[#allocation2 + $0x2b0] sm:$0xff]  ;;  %v804_v29 = vld [vmem:[#allocation2 + $0x2b8] sm:$0xff] }
  0xab   : > { %3943 = vst [vmem:[#allocation8_spill] sm:$0xff] %v2909_v33  ;;  %v467_v39 = vrot.slane %v2909_v33, 3  ;;  %v3900_v40 = vrot.slane %v2909_v33, 4  ;;  %v3899_v43 = vrot.slane %v2909_v33, 5  ;;  %v594_v44 = vrot.slane %v2909_v33, 7  ;;  %v482_v63 = vld [vmem:[#allocation2 + $0x18] sm:$0xff] }
  0xac   : > { %v466_v45 = vrot.slane %v2913_v34, 3  ;;  %v593_v46 = vrot.slane %v2913_v34, 7  ;;  %v661_v48 = vrot.slane %v2909_v33, 1  ;;  %v509_v50 = vrot.slane %v2913_v34, 4 }
  0xad   : > { %v380_v41 = vpop.permute.xlu1 %379  ;;  %v551_v51 = vrot.slane %v2913_v34, 5  ;;  %v3894_v52 = vrot.slane %v2913_v34, 1  ;;  %v378_v53 = vpop.permute.xlu0 %377  ;;  %v2941_v60 = vmul.f32 %v451_v38, %v2909_v33  ;;  %v2944_v61 = vmul.f32 %v631_v42, %v2909_v33 }
  0xae   : > { %v2950_v8 = vmul.f32 %v450_v49, %v2913_v34  ;;  %v2956_v9 = vsel %vm470_vm2, %v466_v45, %v467_v39  ;;  %v2962_v10 = vsel %vm595_vm5, %v593_v46, %v594_v44  ;;  %v2968_v11 = vsel %vm595_vm5, %v3895_v56, %v593_v46  ;;  %v522_v46 = vld [vmem:[#allocation2 + $0x48] sm:$0xff]  ;;  %v444_v49 = vld [vmem:[#allocation2 + $0x340] sm:$0xff] }
  0xaf   : > { %3945 = vst [vmem:[#allocation10_spill] sm:$0xff] %v2956_v9  ;;  %3946 = vst [vmem:[#allocation11_spill] sm:$0xff] %v2962_v10  ;;  %v2974_v15 = vsel %vm511_vm3, %v509_v50, %v3900_v40  ;;  %v2980_v16 = vsel %vm553_vm4, %v551_v51, %v3899_v43  ;;  %v2983_v17 = vmul.f32 %v630_v58, %v2913_v34 }
  0xb0   : > { %3947 = vst [vmem:[#allocation12_spill] sm:$0xff] %v2968_v11  ;;  %3948 = vst [vmem:[#allocation13_spill] sm:$0xff] %v2974_v15  ;;  %v2991_v18 = vsel %vm662_vm6, %v3894_v52, %v661_v48  ;;  %v2997_v21 = vsel %vm470_vm2, %v3898_v37, %v466_v45  ;;  %v3003_v22 = vsel %vm511_vm3, %v3897_v54, %v509_v50  ;;  %v479_v50 = vld [vmem:[#allocation2] sm:$0xff]  ;;  %v673_v37 = vld [vmem:[#allocation2 + $0x148] sm:$0xff] }
  0xb1   : > { %3949 = vst [vmem:[#allocation14_spill] sm:$0xff] %v2980_v16  ;;  %3950 = vst [vmem:[#allocation15_spill] sm:$0xff] %v2991_v18  ;;  %v404_v19 = vpop.permute.xlu1 %403  ;;  %v427_v23 = vsel %vm425_vm0, %v2836_v3, %v380_v41  ;;  %v426_v24 = vsel %vm425_vm0, %v2838_v4, %v378_v53  ;;  %v3013_v32 = vsel %vm553_vm4, %v3896_v55, %v551_v51  ;;  %v402_v4 = vpop.permute.xlu0 %401  ;;  %v829_v51 = vld [vmem:[#allocation2 + $0x2f8] sm:$0xff] }
  0xb2   : > { %3951 = vst [vmem:[#allocation16_spill] sm:$0xff] %v3003_v22  ;;  %3952 = vst [vmem:[#allocation17_spill] sm:$0xff] %v3013_v32  ;;  %v3016_v35 = vmul.f32 %v605_v62, %v2968_v11  ;;  %v614_v38 = vmul.f32 %v606_v0, %v2962_v10  ;;  %v3020_v3 = vmul.f32 %v697_v2, %v2956_v9  ;;  %v564_v0 = vld [vmem:[#allocation2 + $0x88] sm:$0xff]  ;;  %v521_v2 = vld [vmem:[#allocation2 + $0x40] sm:$0xff] }
  0xb3   : > { %v3023_v41 = vmul.f32 %v672_v1, %v2991_v18  ;;  %v3026_v42 = vmul.f32 %v722_v12, %v2974_v15  ;;  %v3029_v45 = vmul.f32 %v747_v13, %v2980_v16  ;;  %v3032_v47 = vsel %vm434_vm1, %v427_v23, %v404_v19  ;;  %v633_v55 = vld [vmem:[#allocation2 + $0x118] sm:$0xff] }
  0xb4   : > { %3953 = vst [vmem:[#allocation18_spill] sm:$0xff] %v3032_v47  ;;  %v3035_v53 = vmul.f32 %v778_v14, %v2997_v21  ;;  %v3038_v58 = vmul.f32 %v779_v20, %v2956_v9  ;;  %v488_v62 = vmul.f32 %v480_v27, %v2956_v9  ;;  %v453_v1 = vmul.f32 %v445_v26, %v3032_v47  ;;  %v563_v14 = vld [vmem:[#allocation2 + $0x80] sm:$0xff]  ;;  %v447_v18 = vld [vmem:[#allocation2 + $0x358] sm:$0xff] }
  0xb5   : > { %v3043_v12 = vmul.f32 %v803_v28, %v3003_v22  ;;  %v3046_v13 = vmul.f32 %v804_v29, %v2974_v15  ;;  %v3049_v19 = vmul.f32 %v828_v30, %v3013_v32  ;;  %v3052_v23 = vsel %vm434_vm1, %v426_v24, %v402_v4  ;;  %v822_v9 = vld [vmem:[#allocation2 + $0x2c0] sm:$0xff] }
  0xb6   : > { %3954 = vst [vmem:[#allocation19_spill] sm:$0xff] %v3038_v58  ;;  %3958 = vst [vmem:[#allocation23_spill] sm:$0xff] %v3052_v23  ;;  %v530_v20 = vmul.f32 %v522_v46, %v2974_v15  ;;  %v496_v27 = vadd.f32 %v488_v62, %v453_v1  ;;  %v487_v52 = vmul.f32 %v479_v50, %v2997_v21  ;;  %v654_v30 = vrot.slane %v3052_v23, 1  ;;  %v3065_v62 = vpop.permute.xlu0 %381  ;;  %v772_v15 = vld [vmem:[#allocation2 + $0x240] sm:$0xff] }
  0xb7   : > { %3955 = vst [vmem:[#allocation20_spill] sm:$0xff] %v3043_v12  ;;  %3956 = vst [vmem:[#allocation21_spill] sm:$0xff] %v3046_v13  ;;  %v452_v26 = vmul.f32 %v444_v49, %v3052_v23  ;;  %v3058_v28 = vmul.f32 %v829_v51, %v2980_v16  ;;  %v572_v29 = vmul.f32 %v564_v0, %v2980_v16  ;;  %v587_v46 = vrot.slane %v3052_v23, 7  ;;  %v632_v51 = vld [vmem:[#allocation2 + $0x110] sm:$0xff]  ;;  %v748_v16 = vld [vmem:[#allocation2 + $0x208] sm:$0xff] }
  0xb8   : > { %3957 = vst [vmem:[#allocation22_spill] sm:$0xff] %v3049_v19  ;;  %v529_v56 = vmul.f32 %v521_v2, %v3003_v22  ;;  %v538_v54 = vadd.f32 %v530_v20, %v496_v27  ;;  %v571_v24 = vmul.f32 %v563_v14, %v3013_v32  ;;  %v3901_v49 = vrot.slane %v3032_v47, 3  ;;  %v384_v2 = vpop.permute.xlu1 %383  ;;  %v699_v27 = vld [vmem:[#allocation2 + $0x190] sm:$0xff]  ;;  %v723_v14 = vld [vmem:[#allocation2 + $0x1c8] sm:$0xff]  ;;  %v775_v32 = vld [vmem:[#allocation2 + $0x258] sm:$0xff] }
  0xb9   : > { %3959 = vst [vmem:[#allocation24_spill] sm:$0xff] %v3058_v28  ;;  %v495_v4 = vadd.f32 %v487_v52, %v452_v26  ;;  %v460_v0 = vrot.slane %v3052_v23, 3  ;;  %v503_v1 = vrot.slane %v3052_v23, 4  ;;  %v3075_v26 = vmul.f32 %v633_v55, %v3032_v47  ;;  %v798_v13 = vld [vmem:[#allocation2 + $0x288] sm:$0xff] }
  0xba   : > { %v580_v20 = vadd.f32 %v572_v29, %v538_v54  ;;  %v545_v43 = vrot.slane %v3052_v23, 5  ;;  %v3082_v50 = vsel %vm662_vm6, %v661_v48, %v654_v30  ;;  %v3091_v55 = vmul.f32 %v632_v51, %v3052_v23  ;;  %v608_v29 = vld [vmem:[#allocation2 + $0xd8] sm:$0xff]  ;;  %v406_v28 = vpop.permute.xlu0 %405 }
  0xbb   : > { %v537_v52 = vadd.f32 %v529_v56, %v495_v4  ;;  %3960 = vst [vmem:[#allocation25_spill] sm:$0xff] %v3082_v50  ;;  %v3088_v56 = vsel %vm595_vm5, %v594_v44, %v587_v46  ;;  %v698_v4 = vld [vmem:[#allocation2 + $0x188] sm:$0xff]  ;;  %v3097_v48 = vsel %vm470_vm2, %v460_v0, %v3901_v49  ;;  %v3963_v44 = vrot.slane %v2909_v33, 4  ;;  %v674_v49 = vld [vmem:[#allocation2 + $0x150] sm:$0xff] }
  0xbc   : > { %v622_v40 = vadd.f32 %v614_v38, %v580_v20  ;;  %3961 = vst [vmem:[#allocation26_spill] sm:$0xff] %v3088_v56  ;;  %v3103_v38 = vsel %vm470_vm2, %v467_v39, %v460_v0  ;;  %v3965_v51 = vrot.slane %v3032_v47, 7  ;;  %v3967_v0 = vrot.slane %v3032_v47, 1 }
  0xbd   : > { %v579_v54 = vadd.f32 %v571_v24, %v537_v52  ;;  %3962 = vst [vmem:[#allocation27_spill] sm:$0xff] %v3103_v38  ;;  %v3109_v24 = vsel %vm511_vm3, %v3963_v44, %v503_v1  ;;  %v681_v44 = vmul.f32 %v673_v37, %v3082_v50 }
  0xbe   : > { %3964 = vst [vmem:[#allocation28_spill] sm:$0xff] %v3109_v24  ;;  %v3115_v20 = vsel %vm595_vm5, %v587_v46, %v3965_v51  ;;  %v647_v52 = vadd.f32 %v2944_v61, %v622_v40  ;;  %v3123_v23 = vsel %vm662_vm6, %v654_v30, %v3967_v0  ;;  %v3969_v46 = vrot.slane %v3032_v47, 4  ;;  %v408_v51 = vpop.permute.xlu1 %407  ;;  %v773_v0 = vld [vmem:[#allocation2 + $0x248] sm:$0xff] }
  0xbf   : > { %3966 = vst [vmem:[#allocation29_spill] sm:$0xff] %v3115_v20  ;;  %v621_v39 = vadd.f32 %v3016_v35, %v579_v54  ;;  %3968 = vst [vmem:[#allocation30_spill] sm:$0xff] %v3123_v23  ;;  %v3970_v61 = vrot.slane %v3032_v47, 5  ;;  %v3972_v30 = vrot.slane %v2909_v33, 5  ;;  %v3145_v54 = vmul.f32 %v607_v59, %v3088_v56  ;;  %v797_v33 = vld [vmem:[#allocation2 + $0x280] sm:$0xff] }
  0xc0   : > { %v3130_v40 = vsel %vm511_vm3, %v503_v1, %v3969_v46  ;;  %v3148_v1 = vmul.f32 %v608_v29, %v3115_v20  ;;  %v689_v50 = vadd.f32 %v681_v44, %v647_v52  ;;  %v3156_v59 = vmul.f32 %v699_v27, %v3097_v48  ;;  %v847_v52 = vld [vmem:[#allocation2 + $0x300] sm:$0xff] }
  0xc1   : > { %v3136_v35 = vsel %vm553_vm4, %v545_v43, %v3970_v61  ;;  %v3142_v37 = vsel %vm553_vm4, %v3972_v30, %v545_v43  ;;  %v646_v46 = vadd.f32 %v2983_v17, %v621_v39  ;;  %v706_v61 = vmul.f32 %v698_v4, %v3103_v38  ;;  %v823_v17 = vld [vmem:[#allocation2 + $0x2c8] sm:$0xff] }
  0xc2   : > { %3971 = vst [vmem:[#allocation31_spill] sm:$0xff] %v3136_v35  ;;  %3973 = vst [vmem:[#allocation32_spill] sm:$0xff] %v3142_v37  ;;  %v3153_v43 = vmul.f32 %v674_v49, %v3123_v23  ;;  %v731_v30 = vmul.f32 %v723_v14, %v3109_v24  ;;  %v429_v29 = vsel %vm425_vm0, %v2846_v5, %v384_v2  ;;  %v848_v49 = vld [vmem:[#allocation2 + $0x308] sm:$0xff] }
  0xc3   : > { %v688_v4 = vadd.f32 %v3023_v41, %v646_v46  ;;  %v714_v39 = vadd.f32 %v706_v61, %v689_v50  ;;  %v756_v44 = vmul.f32 %v748_v16, %v3142_v37  ;;  %v3164_v19 = vsel %vm434_vm1, %v429_v29, %v408_v51  ;;  %v524_v16 = vld [vmem:[#allocation2 + $0x58] sm:$0xff]  ;;  %v481_v46 = vld [vmem:[#allocation2 + $0x10] sm:$0xff]  ;;  %v386_v51 = vpop.permute.xlu0 %385 }
  0xc4   : > { %v780_v27 = vmul.f32 %v772_v15, %v3103_v38  ;;  %v781_v58 = vmul.f32 %v773_v0, %v3097_v48  ;;  %v455_v14 = vmul.f32 %v447_v18, %v3164_v19  ;;  %v490_v5 = vmul.f32 %v482_v63, %v3097_v48  ;;  %v446_v29 = vld [vmem:[#allocation2 + $0x350] sm:$0xff]  ;;  %v872_v63 = vld [vmem:[#allocation2 + $0x380] sm:$0xff] }
  0xc5   : > { %v713_v2 = vadd.f32 %v3020_v3, %v688_v4  ;;  %v739_v10 = vadd.f32 %v731_v30, %v714_v39  ;;  %v805_v41 = vmul.f32 %v797_v33, %v3109_v24  ;;  %v806_v50 = vmul.f32 %v798_v13, %v3130_v40  ;;  %v523_v4 = vld [vmem:[#allocation2 + $0x50] sm:$0xff] }
  0xc6   : > { %v830_v61 = vmul.f32 %v822_v9, %v3142_v37  ;;  %v831_v15 = vmul.f32 %v823_v17, %v3136_v35  ;;  %v3176_v0 = vmul.f32 %v847_v52, %v3088_v56  ;;  %v498_v18 = vadd.f32 %v490_v5, %v455_v14 }
  0xc7   : > { %v738_v3 = vadd.f32 %v3026_v42, %v713_v2  ;;  %v764_v30 = vadd.f32 %v756_v44, %v739_v10  ;;  %v856_v33 = vmul.f32 %v848_v49, %v3115_v20  ;;  %v428_v13 = vsel %vm425_vm0, %v2848_v6, %v3065_v62  ;;  %v566_v44 = vld [vmem:[#allocation2 + $0x98] sm:$0xff]  ;;  %v410_v6 = vpop.permute.xlu1 %409  ;;  %v851_v20 = vld [vmem:[#allocation2 + $0x320] sm:$0xff] }
  0xc8   : > { %v532_v9 = vmul.f32 %v524_v16, %v3130_v40  ;;  %v489_v17 = vmul.f32 %v481_v46, %v3103_v38  ;;  %v3186_v52 = vsel %vm434_vm1, %v428_v13, %v406_v28  ;;  %v430_v39 = vsel %vm425_vm0, %v2856_v7, %v386_v51  ;;  %v565_v16 = vld [vmem:[#allocation2 + $0x90] sm:$0xff]  ;;  %v448_v46 = vld [vmem:[#allocation2 + $0x360] sm:$0xff] }
  0xc9   : > { %v763_v42 = vadd.f32 %v3029_v45, %v738_v3  ;;  %v789_v10 = vadd.f32 %v781_v58, %v764_v30  ;;  %v454_v49 = vmul.f32 %v446_v29, %v3186_v52  ;;  %v462_v14 = vrot.slane %v3186_v52, 3  ;;  %v635_v45 = vld [vmem:[#allocation2 + $0x128] sm:$0xff] }
  0xca   : > { %v3194_v62 = vmul.f32 %v872_v63, %v3123_v23  ;;  %v463_v5 = vrot.slane %v3164_v19, 3  ;;  %v540_v2 = vadd.f32 %v532_v9, %v498_v18  ;;  %v531_v28 = vmul.f32 %v523_v4, %v3109_v24  ;;  %v483_v18 = vld [vmem:[#allocation2 + $0x20] sm:$0xff] }
  0xcb   : > { %v788_v7 = vadd.f32 %v780_v27, %v763_v42  ;;  %v814_v51 = vadd.f32 %v806_v50, %v789_v10  ;;  %v497_v58 = vadd.f32 %v489_v17, %v454_v49  ;;  %v3919_v3 = vrot.slane %v3186_v52, 4  ;;  %v634_v9 = vld [vmem:[#allocation2 + $0x120] sm:$0xff] }
  0xcc   : > { %v574_v30 = vmul.f32 %v566_v44, %v3136_v35  ;;  %v3974_v63 = vrot.slane %v3032_v47, 3  ;;  %v3208_v4 = vsel %vm434_vm1, %v430_v39, %v410_v6  ;;  %v573_v50 = vmul.f32 %v565_v16, %v3142_v37 }
  0xcd   : > { %v813_v27 = vadd.f32 %v805_v41, %v788_v7  ;;  %v539_v17 = vadd.f32 %v531_v28, %v497_v58  ;;  %v456_v42 = vmul.f32 %v448_v46, %v3208_v4  ;;  %v3917_v44 = vrot.slane %v3164_v19, 7  ;;  %v525_v28 = vld [vmem:[#allocation2 + $0x60] sm:$0xff]  ;;  %v485_v58 = vld [vmem:[#allocation2 + $0x30] sm:$0xff] }
  0xce   : > { %v3205_v13 = vsel %vm470_vm2, %v3974_v63, %v462_v14  ;;  %v582_v10 = vadd.f32 %v574_v30, %v540_v2  ;;  %v3214_v49 = vmul.f32 %v635_v45, %v3164_v19  ;;  %v464_v63 = vrot.slane %v3208_v4, 3  ;;  %v636_v45 = vld [vmem:[#allocation2 + $0x130] sm:$0xff] }
  0xcf   : > { %3975 = vst [vmem:[#allocation33_spill] sm:$0xff] %v3205_v13  ;;  %v839_v29 = vadd.f32 %v831_v15, %v814_v51  ;;  %v3976_v39 = vrot.slane %v3032_v47, 4  ;;  %v581_v6 = vadd.f32 %v573_v50, %v539_v17  ;;  %v491_v2 = vmul.f32 %v483_v18, %v3205_v13  ;;  %v486_v18 = vld [vmem:[#allocation2 + $0x38] sm:$0xff] }
  0xd0   : > { %v838_v16 = vadd.f32 %v830_v61, %v813_v27  ;;  %v3918_v46 = vrot.slane %v3186_v52, 7  ;;  %v3228_v7 = vmul.f32 %v634_v9, %v3186_v52  ;;  %v3234_v30 = vsel %vm470_vm2, %v463_v5, %v464_v63 }
  0xd1   : > { %v3223_v41 = vsel %vm511_vm3, %v3976_v39, %v3919_v3  ;;  %v623_v51 = vadd.f32 %v3145_v54, %v581_v6  ;;  %v499_v50 = vadd.f32 %v491_v2, %v456_v42  ;;  %v3916_v17 = vrot.slane %v3208_v4, 7  ;;  %v724_v42 = vld [vmem:[#allocation2 + $0x1d0] sm:$0xff] }
  0xd2   : > { %3977 = vst [vmem:[#allocation34_spill] sm:$0xff] %v3223_v41  ;;  %v624_v61 = vadd.f32 %v3148_v1, %v582_v10  ;;  %v3978_v27 = vrot.slane %v2904_v31, 3  ;;  %v533_v54 = vmul.f32 %v525_v28, %v3223_v41  ;;  %v3246_v6 = vadd.f32 %v856_v33, %v839_v29  ;;  %v484_v1 = vld [vmem:[#allocation2 + $0x28] sm:$0xff]  ;;  %v567_v29 = vld [vmem:[#allocation2 + $0xa0] sm:$0xff] }
  0xd3   : > { %v648_v15 = vadd.f32 %v3091_v55, %v623_v51  ;;  %v3251_v2 = vmul.f32 %v636_v45, %v3208_v4  ;;  %v3254_v10 = vadd.f32 %v3176_v0, %v838_v16  ;;  %v547_v33 = vrot.slane %v3186_v52, 5  ;;  %v777_v28 = vld [vmem:[#allocation2 + $0x268] sm:$0xff] }
  0xd4   : > { %v3242_v9 = vsel %vm470_vm2, %v464_v63, %v3978_v27  ;;  %v493_v63 = vmul.f32 %v485_v58, %v3234_v30  ;;  %v3259_v27 = vsel %vm470_vm2, %v462_v14, %v463_v5  ;;  %v541_v45 = vadd.f32 %v533_v54, %v499_v50  ;;  %v609_v58 = vld [vmem:[#allocation2 + $0xe0] sm:$0xff]  ;;  %v611_v54 = vld [vmem:[#allocation2 + $0xf0] sm:$0xff] }
  0xd5   : > { %v690_v55 = vadd.f32 %v3153_v43, %v648_v15  ;;  %v3264_v51 = vmul.f32 %v486_v18, %v3242_v9  ;;  %v3272_v0 = vsel %vm595_vm5, %v3917_v44, %v3916_v17  ;;  %v492_v14 = vmul.f32 %v484_v1, %v3259_v27  ;;  %v675_v18 = vld [vmem:[#allocation2 + $0x158] sm:$0xff] }
  0xd6   : > { %v3979_v5 = vrot.slane %v3032_v47, 5  ;;  %v3980_v16 = vrot.slane %v3032_v47, 7  ;;  %v656_v50 = vrot.slane %v3186_v52, 1  ;;  %v3295_v39 = vadd.f32 %v493_v63, %v2950_v8  ;;  %v700_v1 = vld [vmem:[#allocation2 + $0x198] sm:$0xff]  ;;  %v526_v63 = vld [vmem:[#allocation2 + $0x68] sm:$0xff] }
  0xd7   : > { %v3318_v23 = vmul.f32 %v611_v54, %v3272_v0  ;;  %v3336_v24 = vmul.f32 %v851_v20, %v3272_v0 }
  0xd8   : > { %v3279_v43 = vsel %vm553_vm4, %v3979_v5, %v547_v33  ;;  %v3287_v15 = vsel %vm595_vm5, %v3980_v16, %v3918_v46  ;;  %v649_v5 = vadd.f32 %v3075_v26, %v624_v61  ;;  %v3298_v16 = vmul.f32 %v777_v28, %v3242_v9 }
  0xd9   : > { %v575_v17 = vmul.f32 %v567_v29, %v3279_v43  ;;  %v3981_v46 = vrot.slane %v3032_v47, 1  ;;  %v715_v29 = vadd.f32 %v3156_v59, %v690_v55  ;;  %v3983_v26 = vrot.slane %v3164_v19, 4 }
  0xda   : > { %v3984_v61 = vrot.slane %v3186_v52, 4  ;;  %v617_v44 = vmul.f32 %v609_v58, %v3287_v15  ;;  %v500_v59 = vadd.f32 %v492_v14, %v2920_v36  ;;  %v3985_v55 = vrot.slane %v3164_v19, 1  ;;  %v774_v14 = vld [vmem:[#allocation2 + $0x250] sm:$0xff] }
  0xdb   : > { %v3304_v3 = vsel %vm662_vm6, %v3981_v46, %v656_v50  ;;  %v583_v28 = vadd.f32 %v575_v17, %v541_v45  ;;  %v749_v46 = vld [vmem:[#allocation2 + $0x210] sm:$0xff]  ;;  %v732_v17 = vmul.f32 %v724_v42, %v3130_v40  ;;  %v3986_v45 = vrot.slane %v3164_v19, 5  ;;  %v750_v42 = vld [vmem:[#allocation2 + $0x218] sm:$0xff] }
  0xdc   : > { %3982 = vst [vmem:[#allocation35_spill] sm:$0xff] %v3304_v3  ;;  %v3313_v8 = vsel %vm511_vm3, %v3984_v61, %v3983_v26  ;;  %v683_v47 = vmul.f32 %v675_v18, %v3304_v3  ;;  %v3325_v56 = vsel %vm662_vm6, %v656_v50, %v3985_v55  ;;  %v676_v26 = vld [vmem:[#allocation2 + $0x160] sm:$0xff]  ;;  %v725_v61 = vld [vmem:[#allocation2 + $0x1d8] sm:$0xff]  ;;  %v568_v18 = vld [vmem:[#allocation2 + $0xa8] sm:$0xff]  ;;  %v708_v36 = vmul.f32 %v700_v1, %v3205_v13 }
  0xdd   : > { %v3332_v58 = vsel %vm553_vm4, %v547_v33, %v3986_v45  ;;  %v625_v54 = vadd.f32 %v617_v44, %v583_v28  ;;  %v534_v50 = vmul.f32 %v526_v63, %v3313_v8  ;;  %v701_v55 = vld [vmem:[#allocation2 + $0x1a0] sm:$0xff]  ;;  %v740_v38 = vadd.f32 %v732_v17, %v715_v29  ;;  %v799_v1 = vld [vmem:[#allocation2 + $0x290] sm:$0xff] }
  0xde   : > { %v691_v37 = vadd.f32 %v683_v47, %v649_v5  ;;  %v757_v11 = vmul.f32 %v749_v46, %v3136_v35  ;;  %v684_v33 = vmul.f32 %v676_v26, %v3325_v56  ;;  %v726_v44 = vld [vmem:[#allocation2 + $0x1e0] sm:$0xff]  ;;  %v733_v47 = vmul.f32 %v725_v61, %v3223_v41  ;;  %v824_v26 = vld [vmem:[#allocation2 + $0x2d0] sm:$0xff] }
  0xdf   : > { %v650_v12 = vadd.f32 %v3228_v7, %v625_v54  ;;  %v542_v5 = vadd.f32 %v534_v50, %v500_v59  ;;  %v576_v20 = vmul.f32 %v568_v18, %v3332_v58  ;;  %v782_v63 = vmul.f32 %v774_v14, %v3205_v13  ;;  %v897_v29 = vld [vmem:[#allocation2 + $0x3c0] sm:$0xff]  ;;  %v849_v50 = vld [vmem:[#allocation2 + $0x310] sm:$0xff] }
  0xe0   : > { %v716_v45 = vadd.f32 %v708_v36, %v691_v37  ;;  %v765_v28 = vadd.f32 %v757_v11, %v740_v38  ;;  %v709_v46 = vmul.f32 %v701_v55, %v3259_v27  ;;  %v758_v7 = vmul.f32 %v750_v42, %v3279_v43  ;;  %v873_v37 = vld [vmem:[#allocation2 + $0x388] sm:$0xff]  ;;  %v751_v61 = vld [vmem:[#allocation2 + $0x220] sm:$0xff] }
  0xe1   : > { %v692_v17 = vadd.f32 %v684_v33, %v650_v12  ;;  %v734_v54 = vmul.f32 %v726_v44, %v3313_v8  ;;  %v807_v59 = vmul.f32 %v799_v1, %v3223_v41  ;;  %v888_v11 = vadd.f32 %v3194_v62, %v3254_v10  ;;  %v922_v38 = vld [vmem:[#allocation2 + $0x400] sm:$0xff] }
  0xe2   : > { %v741_v22 = vadd.f32 %v733_v47, %v716_v45  ;;  %v790_v36 = vadd.f32 %v782_v63, %v765_v28  ;;  %v783_v12 = vmul.f32 %v775_v32, %v3259_v27  ;;  %v905_v55 = vmul.f32 %v897_v29, %v3097_v48  ;;  %v776_v33 = vld [vmem:[#allocation2 + $0x260] sm:$0xff]  ;;  %v800_v45 = vld [vmem:[#allocation2 + $0x298] sm:$0xff] }
  0xe3   : > { %v717_v18 = vadd.f32 %v709_v46, %v692_v17  ;;  %v3353_v42 = vadd.f32 %v576_v20, %v542_v5  ;;  %v832_v47 = vmul.f32 %v824_v26, %v3279_v43  ;;  %v881_v1 = vmul.f32 %v873_v37, %v3304_v3  ;;  %v947_v28 = vld [vmem:[#allocation2 + $0x440] sm:$0xff]  ;;  %v825_v63 = vld [vmem:[#allocation2 + $0x2d8] sm:$0xff]  ;;  %v898_v17 = vld [vmem:[#allocation2 + $0x3c8] sm:$0xff] }
  0xe4   : > { %v766_v14 = vadd.f32 %v758_v7, %v741_v22  ;;  %v815_v44 = vadd.f32 %v807_v59, %v790_v36  ;;  %v759_v62 = vmul.f32 %v751_v61, %v3332_v58  ;;  %v874_v22 = vld [vmem:[#allocation2 + $0x390] sm:$0xff]  ;;  %v913_v32 = vadd.f32 %v905_v55, %v888_v11  ;;  %v972_v26 = vld [vmem:[#allocation2 + $0x480] sm:$0xff] }
  0xe5   : > { %v930_v46 = vmul.f32 %v922_v38, %v3130_v40  ;;  %v742_v29 = vadd.f32 %v734_v54, %v717_v18  ;;  %v857_v20 = vmul.f32 %v849_v50, %v3287_v15  ;;  %v889_v7 = vadd.f32 %v881_v1, %v3246_v6  ;;  %v899_v36 = vld [vmem:[#allocation2 + $0x3d0] sm:$0xff]  ;;  %v997_v18 = vld [vmem:[#allocation2 + $0x4c0] sm:$0xff] }
  0xe6   : > { %v791_v10 = vadd.f32 %v783_v12, %v766_v14  ;;  %v840_v5 = vadd.f32 %v832_v47, %v815_v44  ;;  %v784_v37 = vmul.f32 %v776_v33, %v3234_v30  ;;  %v808_v59 = vmul.f32 %v800_v45, %v3313_v8  ;;  %v924_v61 = vld [vmem:[#allocation2 + $0x410] sm:$0xff]  ;;  %v1022_v45 = vld [vmem:[#allocation2 + $0x500] sm:$0xff] }
  0xe7   : > { %v938_v14 = vadd.f32 %v930_v46, %v913_v32  ;;  %v955_v12 = vmul.f32 %v947_v28, %v3136_v35  ;;  %v833_v11 = vmul.f32 %v825_v63, %v3332_v58  ;;  %v882_v54 = vmul.f32 %v874_v22, %v3325_v56  ;;  %v949_v44 = vld [vmem:[#allocation2 + $0x450] sm:$0xff] }
  0xe8   : > { %v865_v55 = vadd.f32 %v857_v20, %v840_v5  ;;  %v906_v38 = vmul.f32 %v898_v17, %v3205_v13  ;;  %v816_v50 = vadd.f32 %v808_v59, %v791_v10  ;;  %v907_v6 = vmul.f32 %v899_v36, %v3259_v27  ;;  %v527_v1 = vld [vmem:[#allocation2 + $0x70] sm:$0xff]  ;;  %v1047_v5 = vld [vmem:[#allocation2 + $0x540] sm:$0xff]  ;;  %v610_v20 = vld [vmem:[#allocation2 + $0xe8] sm:$0xff] }
  0xe9   : > { %v963_v47 = vadd.f32 %v955_v12, %v938_v14  ;;  %v980_v33 = vmul.f32 %v972_v26, %v3205_v13  ;;  %v767_v32 = vadd.f32 %v759_v62, %v742_v29  ;;  %v932_v63 = vmul.f32 %v924_v61, %v3313_v8  ;;  %v1072_v12 = vld [vmem:[#allocation2 + $0x580] sm:$0xff] }
  0xea   : > { %v890_v46 = vadd.f32 %v882_v54, %v865_v55  ;;  %v914_v28 = vadd.f32 %v906_v38, %v889_v7  ;;  %v1005_v17 = vmul.f32 %v997_v18, %v3223_v41  ;;  %v3987_v10 = vrot.slane %v3208_v4, 4  ;;  %v569_v7 = vld [vmem:[#allocation2 + $0xb0] sm:$0xff]  ;;  %v1147_v13 = vld [vmem:[#allocation2 + $0x640] sm:$0xff] }
  0xeb   : > { %v988_v22 = vadd.f32 %v980_v33, %v963_v47  ;;  %v3988_v36 = vrot.slane %v3164_v19, 4  ;;  %v3989_v26 = vrot.slane %v3208_v4, 5  ;;  %v3990_v62 = vrot.slane %v3164_v19, 5 }
  0xec   : > { %v957_v61 = vmul.f32 %v949_v44, %v3332_v58  ;;  %v1030_v14 = vmul.f32 %v1022_v45, %v3279_v43  ;;  %v3991_v54 = vrot.slane %v3164_v19, 7  ;;  %v3992_v38 = vrot.slane %v3186_v52, 7  ;;  %v850_v45 = vld [vmem:[#allocation2 + $0x318] sm:$0xff] }
  0xed   : > { %v3377_v59 = vsel %vm511_vm3, %v3988_v36, %v3987_v10  ;;  %v3385_v29 = vsel %vm553_vm4, %v3990_v62, %v3989_v26  ;;  %v841_v47 = vadd.f32 %v833_v11, %v816_v50  ;;  %v1013_v33 = vadd.f32 %v1005_v17, %v988_v22  ;;  %v1097_v36 = vld [vmem:[#allocation2 + $0x5c0] sm:$0xff] }
  0xee   : > { %v535_v55 = vmul.f32 %v527_v1, %v3377_v59  ;;  %v3396_v18 = vsel %vm595_vm5, %v3992_v38, %v3991_v54  ;;  %v1055_v10 = vmul.f32 %v1047_v5, %v3287_v15  ;;  %v1122_v26 = vld [vmem:[#allocation2 + $0x600] sm:$0xff]  ;;  %v915_v62 = vadd.f32 %v907_v6, %v890_v46  ;;  %v677_v15 = vld [vmem:[#allocation2 + $0x168] sm:$0xff] }
  0xef   : > { %v618_v44 = vmul.f32 %v610_v20, %v3396_v18  ;;  %v577_v3 = vmul.f32 %v569_v7, %v3385_v29  ;;  %v3993_v35 = vrot.slane %v3208_v4, 1  ;;  %v3994_v54 = vrot.slane %v3164_v19, 1  ;;  %v1172_v6 = vld [vmem:[#allocation2 + $0x680] sm:$0xff] }
  0xf0   : > { %v543_v1 = vadd.f32 %v535_v55, %v3295_v39  ;;  %v3410_v50 = vadd.f32 %v784_v37, %v767_v32  ;;  %v1038_v5 = vadd.f32 %v1030_v14, %v1013_v33  ;;  %v1080_v20 = vmul.f32 %v1072_v12, %v3186_v52  ;;  %v923_v39 = vld [vmem:[#allocation2 + $0x408] sm:$0xff] }
  0xf1   : > { %v3408_v11 = vsel %vm662_vm6, %v3994_v54, %v3993_v35  ;;  %v626_v46 = vadd.f32 %v618_v44, %v3353_v42  ;;  %v1105_v22 = vmul.f32 %v1097_v36, %v3325_v56  ;;  %v1130_v17 = vmul.f32 %v1122_v26, %v3259_v27  ;;  %v702_v55 = vld [vmem:[#allocation2 + $0x1a8] sm:$0xff]  ;;  %v875_v35 = vld [vmem:[#allocation2 + $0x398] sm:$0xff]  ;;  %v801_v36 = vld [vmem:[#allocation2 + $0x2a0] sm:$0xff] }
  0xf2   : > { %v585_v7 = vadd.f32 %v577_v3, %v543_v1  ;;  %v858_v38 = vmul.f32 %v850_v45, %v3396_v18  ;;  %v1063_v54 = vadd.f32 %v1055_v10, %v1038_v5  ;;  %v1155_v37 = vmul.f32 %v1147_v13, %v3313_v8  ;;  %v727_v14 = vld [vmem:[#allocation2 + $0x1e8] sm:$0xff]  ;;  %v925_v5 = vld [vmem:[#allocation2 + $0x418] sm:$0xff] }
  0xf3   : > { %v651_v32 = vadd.f32 %v3214_v49, %v626_v46  ;;  %v685_v52 = vmul.f32 %v677_v15, %v3408_v11  ;;  %v948_v12 = vld [vmem:[#allocation2 + $0x448] sm:$0xff]  ;;  %v940_v42 = vadd.f32 %v932_v63, %v915_v62  ;;  %v1180_v33 = vmul.f32 %v1172_v6, %v3332_v58  ;;  %v826_v63 = vld [vmem:[#allocation2 + $0x2e0] sm:$0xff]  ;;  %v900_v62 = vld [vmem:[#allocation2 + $0x3d8] sm:$0xff] }
  0xf4   : > { %v752_v56 = vld [vmem:[#allocation2 + $0x228] sm:$0xff]  ;;  %v866_v3 = vadd.f32 %v858_v38, %v841_v47  ;;  %v931_v26 = vmul.f32 %v923_v39, %v3223_v41  ;;  %v1088_v44 = vadd.f32 %v1080_v20, %v1063_v54  ;;  %v710_v10 = vmul.f32 %v702_v55, %v3234_v30 }
  0xf5   : > { %v693_v45 = vadd.f32 %v685_v52, %v651_v32  ;;  %v883_v13 = vmul.f32 %v875_v35, %v3408_v11  ;;  %v973_v49 = vld [vmem:[#allocation2 + $0x488] sm:$0xff]  ;;  %v627_v1 = vadd.f32 %v3318_v23, %v585_v7  ;;  %v735_v15 = vmul.f32 %v727_v14, %v3377_v59 }
  0xf6   : > { %v939_v6 = vadd.f32 %v931_v26, %v914_v28  ;;  %v956_v46 = vmul.f32 %v948_v12, %v3279_v43  ;;  %v1113_v47 = vadd.f32 %v1105_v22, %v1088_v44  ;;  %v760_v39 = vmul.f32 %v752_v56, %v3385_v29  ;;  %v998_v55 = vld [vmem:[#allocation2 + $0x4c8] sm:$0xff] }
  0xf7   : > { %v809_v20 = vmul.f32 %v801_v36, %v3377_v59  ;;  %v891_v38 = vadd.f32 %v883_v13, %v866_v3  ;;  %v1023_v54 = vld [vmem:[#allocation2 + $0x508] sm:$0xff]  ;;  %v965_v35 = vadd.f32 %v957_v61, %v940_v42  ;;  %v718_v32 = vadd.f32 %v710_v10, %v693_v45 }
  0xf8   : > { %v964_v52 = vadd.f32 %v956_v46, %v939_v6  ;;  %v981_v23 = vmul.f32 %v973_v49, %v3259_v27  ;;  %v1048_v7 = vld [vmem:[#allocation2 + $0x548] sm:$0xff]  ;;  %v1138_v41 = vadd.f32 %v1130_v17, %v1113_v47  ;;  %v834_v28 = vmul.f32 %v826_v63, %v3385_v29  ;;  %v678_v27 = vld [vmem:[#allocation2 + $0x170] sm:$0xff] }
  0xf9   : > { %v1073_v14 = vld [vmem:[#allocation2 + $0x588] sm:$0xff]  ;;  %v908_v12 = vmul.f32 %v900_v62, %v3234_v30  ;;  %v933_v22 = vmul.f32 %v925_v5, %v3377_v59  ;;  %v652_v36 = vadd.f32 %v3251_v2, %v627_v1  ;;  %v1006_v26 = vmul.f32 %v998_v55, %v3313_v8  ;;  %v703_v1 = vld [vmem:[#allocation2 + $0x1b0] sm:$0xff] }
  0xfa   : > { %v1098_v56 = vld [vmem:[#allocation2 + $0x5c8] sm:$0xff]  ;;  %v989_v3 = vadd.f32 %v981_v23, %v964_v52  ;;  %v1031_v61 = vmul.f32 %v1023_v54, %v3332_v58  ;;  %v1163_v45 = vadd.f32 %v1155_v37, %v1138_v41  ;;  %v1056_v17 = vmul.f32 %v1048_v7, %v3396_v18  ;;  %v728_v52 = vld [vmem:[#allocation2 + $0x1f0] sm:$0xff] }
  0xfb   : > { %v1123_v42 = vld [vmem:[#allocation2 + $0x608] sm:$0xff]  ;;  %v916_v10 = vadd.f32 %v908_v12, %v891_v38  ;;  %v1081_v13 = vmul.f32 %v1073_v14, %v3164_v19  ;;  %v743_v49 = vadd.f32 %v735_v15, %v718_v32  ;;  %v1106_v62 = vmul.f32 %v1098_v56, %v3408_v11  ;;  %v974_v15 = vld [vmem:[#allocation2 + $0x490] sm:$0xff]  ;;  %v528_v38 = vld [vmem:[#allocation2 + $0x78] sm:$0xff] }
  0xfc   : > { %v1148_v44 = vld [vmem:[#allocation2 + $0x648] sm:$0xff]  ;;  %v1014_v63 = vadd.f32 %v1006_v26, %v989_v3  ;;  %v3995_v2 = vrot.slane %v2904_v31, 1  ;;  %v3996_v8 = vrot.slane %v3208_v4, 1  ;;  %v1188_v41 = vadd.f32 %v1180_v33, %v1163_v45  ;;  %v570_v32 = vld [vmem:[#allocation2 + $0xb8] sm:$0xff]  ;;  %v999_v3 = vld [vmem:[#allocation2 + $0x4d0] sm:$0xff] }
  0xfd   : > { %v1173_v5 = vld [vmem:[#allocation2 + $0x688] sm:$0xff]  ;;  %v1131_v37 = vmul.f32 %v1123_v42, %v3234_v30  ;;  %v1156_v18 = vmul.f32 %v1148_v44, %v3377_v59  ;;  %v3997_v11 = vrot.slane %v2904_v31, 4  ;;  %v3998_v46 = vrot.slane %v3208_v4, 4  ;;  %v753_v42 = vld [vmem:[#allocation2 + $0x230] sm:$0xff]  ;;  %v876_v45 = vld [vmem:[#allocation2 + $0x3a0] sm:$0xff] }
  0xfe   : > { %v3445_v58 = vsel %vm662_vm6, %v3996_v8, %v3995_v2  ;;  %v1039_v6 = vadd.f32 %v1031_v61, %v1014_v63  ;;  %v3999_v55 = vrot.slane %v2904_v31, 5  ;;  %v4000_v33 = vrot.slane %v3208_v4, 5  ;;  %2446 = vmatprep.mubr.msk.f32.mxu0 %vm1215_vm7, %v1188_v41  ;;  %v802_v44 = vld [vmem:[#allocation2 + $0x2a8] sm:$0xff] }
  0xff   : > { %v686_v19 = vmul.f32 %v678_v27, %v3445_v58  ;;  %v3456_v47 = vsel %vm511_vm3, %v3998_v46, %v3997_v11  ;;  %v817_v23 = vadd.f32 %v809_v20, %v3410_v50  ;;  %v3468_v7 = vadd.f32 %v933_v22, %v916_v10  ;;  %v827_v2 = vld [vmem:[#allocation2 + $0x2e8] sm:$0xff]  ;;  %v1074_v46 = vld [vmem:[#allocation2 + $0x590] sm:$0xff] }
 0x100   : > { %v3464_v54 = vsel %vm553_vm4, %v4000_v33, %v3999_v55  ;;  %v1181_v14 = vmul.f32 %v1173_v5, %v3385_v29  ;;  %v711_v56 = vmul.f32 %v703_v1, %v3242_v9  ;;  %v768_v26 = vadd.f32 %v760_v39, %v743_v49  ;;  %v1024_v5 = vld [vmem:[#allocation2 + $0x510] sm:$0xff]  ;;  %v901_v39 = vld [vmem:[#allocation2 + $0x3e0] sm:$0xff] }
 0x101   : > { %v694_v12 = vadd.f32 %v686_v19, %v652_v36  ;;  %v1064_v61 = vadd.f32 %v1056_v17, %v1039_v6  ;;  %v842_v27 = vadd.f32 %v834_v28, %v817_v23  ;;  %v982_v63 = vmul.f32 %v974_v15, %v3234_v30  ;;  %v1049_v19 = vld [vmem:[#allocation2 + $0x550] sm:$0xff]  ;;  %v926_v6 = vld [vmem:[#allocation2 + $0x420] sm:$0xff] }
 0x102   : > { %v536_v50 = vmul.f32 %v528_v38, %v3456_v47  ;;  %v578_v20 = vmul.f32 %v570_v32, %v3464_v54  ;;  %v736_v10 = vmul.f32 %v728_v52, %v3456_v47  ;;  %v1007_v49 = vmul.f32 %v999_v3, %v3377_v59  ;;  %v1099_v38 = vld [vmem:[#allocation2 + $0x5d0] sm:$0xff]  ;;  %v612_v52 = vld [vmem:[#allocation2 + $0xf8] sm:$0xff] }
 0x103   : > { %v719_v22 = vadd.f32 %v711_v56, %v694_v12  ;;  %v1089_v36 = vadd.f32 %v1081_v13, %v1064_v61  ;;  %v867_v8 = vadd.f32 %v3336_v24, %v842_v27  ;;  %v990_v17 = vadd.f32 %v982_v63, %v965_v35  ;;  %v1124_v3 = vld [vmem:[#allocation2 + $0x610] sm:$0xff] }
 0x104   : > { %v761_v1 = vmul.f32 %v753_v42, %v3464_v54  ;;  %v810_v30 = vmul.f32 %v802_v44, %v3456_v47  ;;  %v884_v41 = vmul.f32 %v876_v45, %v3445_v58  ;;  %v1032_v13 = vmul.f32 %v1024_v5, %v3385_v29  ;;  %v1149_v27 = vld [vmem:[#allocation2 + $0x650] sm:$0xff] }
 0x105   : > { %v744_v28 = vadd.f32 %v736_v10, %v719_v22  ;;  %v1114_v15 = vadd.f32 %v1106_v62, %v1089_v36  ;;  %v1015_v11 = vadd.f32 %v1007_v49, %v990_v17  ;;  %v502_v24 = vadd.f32 %v3264_v51, %v2941_v60  ;;  %v1174_v22 = vld [vmem:[#allocation2 + $0x690] sm:$0xff] }
 0x106   : > { %v835_v59 = vmul.f32 %v827_v2, %v3464_v54  ;;  %v892_v35 = vadd.f32 %v884_v41, %v867_v8  ;;  %v909_v55 = vmul.f32 %v901_v39, %v3242_v9  ;;  %v4001_v33 = vrot.slane %v2904_v31, 7  ;;  %v950_v8 = vld [vmem:[#allocation2 + $0x458] sm:$0xff] }
 0x107   : > { %v4002_v32 = vrot.slane %v3208_v4, 7  ;;  %v1139_v23 = vadd.f32 %v1131_v37, %v1114_v15  ;;  %v1040_v12 = vadd.f32 %v1032_v13, %v1015_v11  ;;  %v1057_v56 = vmul.f32 %v1049_v19, %v3272_v0  ;;  %v704_v37 = vld [vmem:[#allocation2 + $0x1b8] sm:$0xff]  ;;  %v877_v11 = vld [vmem:[#allocation2 + $0x3a8] sm:$0xff] }
 0x108   : > { %v544_v60 = vadd.f32 %v536_v50, %v502_v24  ;;  %v769_v51 = vadd.f32 %v761_v1, %v744_v28  ;;  %v934_v61 = vmul.f32 %v926_v6, %v3456_v47  ;;  %v1082_v42 = vmul.f32 %v1074_v46, %v3208_v4  ;;  %v729_v28 = vld [vmem:[#allocation2 + $0x1f8] sm:$0xff]  ;;  %v852_v1 = vld [vmem:[#allocation2 + $0x328] sm:$0xff] }
 0x109   : > { %v3492_v62 = vsel %vm595_vm5, %v4002_v32, %v4001_v33  ;;  %v1107_v44 = vmul.f32 %v1099_v38, %v3445_v58  ;;  %v1164_v45 = vadd.f32 %v1156_v18, %v1139_v23  ;;  %v1065_v63 = vadd.f32 %v1057_v56, %v1040_v12  ;;  %v679_v58 = vld [vmem:[#allocation2 + $0x178] sm:$0xff]  ;;  %v976_v56 = vld [vmem:[#allocation2 + $0x4a0] sm:$0xff] }
 0x10a   : > { %v586_v10 = vadd.f32 %v578_v20, %v544_v60  ;;  %v620_v5 = vmul.f32 %v612_v52, %v3492_v62  ;;  %v917_v36 = vadd.f32 %v909_v55, %v892_v35  ;;  %v1132_v0 = vmul.f32 %v1124_v3, %v3242_v9  ;;  %v975_v15 = vld [vmem:[#allocation2 + $0x498] sm:$0xff]  ;;  %v902_v52 = vld [vmem:[#allocation2 + $0x3e8] sm:$0xff]  ;;  %v4006_v3 = vld [vmem:[#allocation17_spill] sm:$0xff] }
 0x10b   : > { %v4003_v50 = vrot.slane %v2913_v34, 1  ;;  %v4004_v2 = vrot.slane %v2904_v31, 1  ;;  %v793_v18 = vadd.f32 %v3298_v16, %v768_v26  ;;  %v1189_v39 = vadd.f32 %v1181_v14, %v1164_v45  ;;  %v754_v26 = vld [vmem:[#allocation2 + $0x238] sm:$0xff] }
 0x10c   : > { %v1090_v20 = vadd.f32 %v1082_v42, %v1065_v63  ;;  %v1157_v17 = vmul.f32 %v1149_v27, %v3456_v47  ;;  %v628_v49 = vadd.f32 %v620_v5, %v586_v10  ;;  %v794_v41 = vadd.f32 %v3035_v53, %v769_v51  ;;  %v1000_v46 = vld [vmem:[#allocation2 + $0x4d8] sm:$0xff]  ;;  %v4005_v53 = vld [vmem:[#allocation16_spill] sm:$0xff]  ;;  %v1001_v5 = vld [vmem:[#allocation2 + $0x4e0] sm:$0xff] }
 0x10d   : > { %v3506_v4 = vsel %vm662_vm6, %v4004_v2, %v4003_v50  ;;  %v1182_v19 = vmul.f32 %v1174_v22, %v3464_v54  ;;  %v712_v31 = vmul.f32 %v704_v37, %v2997_v21  ;;  %v818_v25 = vadd.f32 %v810_v30, %v793_v18  ;;  %2447 = vmatmul.mubr.msk.f32.vlgmr.msra.gmra.mxu0 %vm1215_vm7, %v1189_v39  ;;  %v951_v30 = vld [vmem:[#allocation2 + $0x460] sm:$0xff]  ;;  %v1025_v12 = vld [vmem:[#allocation2 + $0x518] sm:$0xff]  ;;  %v853_v37 = vld [vmem:[#allocation2 + $0x330] sm:$0xff] }
 0x10e   : > { %v1115_v6 = vadd.f32 %v1107_v44, %v1090_v20  ;;  %v653_v16 = vadd.f32 %v2937_v57, %v628_v49  ;;  %v687_v14 = vmul.f32 %v679_v58, %v3506_v4  ;;  %v958_v13 = vmul.f32 %v950_v8, %v3385_v29  ;;  %v927_v44 = vld [vmem:[#allocation2 + $0x428] sm:$0xff]  ;;  %v1050_v45 = vld [vmem:[#allocation2 + $0x558] sm:$0xff]  ;;  %v1026_v49 = vld [vmem:[#allocation2 + $0x520] sm:$0xff] }
 0x10f   : > { %v942_v38 = vadd.f32 %v934_v61, %v917_v36  ;;  %v737_v24 = vmul.f32 %v729_v28, %v4005_v53  ;;  %v843_v35 = vadd.f32 %v835_v59, %v818_v25  ;;  %v860_v55 = vmul.f32 %v852_v1, %v3492_v62  ;;  %v854_v36 = vld [vmem:[#allocation2 + $0x338] sm:$0xff]  ;;  %v952_v58 = vld [vmem:[#allocation2 + $0x468] sm:$0xff] }
 0x110   : > { %v1140_v33 = vadd.f32 %v1132_v0, %v1115_v6  ;;  %v695_v32 = vadd.f32 %v687_v14, %v653_v16  ;;  %v966_v23 = vadd.f32 %v958_v13, %v3468_v7  ;;  %v983_v57 = vmul.f32 %v975_v15, %v3242_v9  ;;  %v4007_v18 = vld [vmem:[#allocation20_spill] sm:$0xff]  ;;  %v1100_v1 = vld [vmem:[#allocation2 + $0x5d8] sm:$0xff]  ;;  %v4009_v16 = vld [vmem:[#allocation11_spill] sm:$0xff] }
 0x111   : > { %v762_v60 = vmul.f32 %v754_v26, %v4006_v3  ;;  %v868_v29 = vadd.f32 %v860_v55, %v843_v35  ;;  %v885_v51 = vmul.f32 %v877_v11, %v3506_v4  ;;  %v1008_v61 = vmul.f32 %v1000_v46, %v3456_v47  ;;  %v977_v25 = vld [vmem:[#allocation2 + $0x4a8] sm:$0xff]  ;;  %v1051_v26 = vld [vmem:[#allocation2 + $0x560] sm:$0xff]  ;;  %v903_v13 = vld [vmem:[#allocation2 + $0x3f0] sm:$0xff] }
 0x112   : > { %v1165_v59 = vadd.f32 %v1157_v17, %v1140_v33  ;;  %v720_v42 = vadd.f32 %v712_v31, %v695_v32  ;;  %v991_v27 = vadd.f32 %v983_v57, %v966_v23  ;;  %v959_v63 = vmul.f32 %v951_v30, %v3464_v54  ;;  %v4008_v15 = vld [vmem:[#allocation12_spill] sm:$0xff]  ;;  %v4010_v46 = vld [vmem:[#allocation19_spill] sm:$0xff]  ;;  %v4011_v33 = vld [vmem:[#allocation22_spill] sm:$0xff] }
 0x113   : > { %v893_v22 = vadd.f32 %v885_v51, %v868_v29  ;;  %v910_v7 = vmul.f32 %v902_v52, %v2997_v21  ;;  %v1033_v9 = vmul.f32 %v1025_v12, %v3464_v54  ;;  %v984_v10 = vmul.f32 %v976_v56, %v2997_v21  ;;  %v1002_v30 = vld [vmem:[#allocation2 + $0x4e8] sm:$0xff]  ;;  %v1125_v23 = vld [vmem:[#allocation2 + $0x618] sm:$0xff]  ;;  %v1076_v57 = vld [vmem:[#allocation2 + $0x5a0] sm:$0xff] }
 0x114   : > { %v1190_v0 = vadd.f32 %v1182_v19, %v1165_v59  ;;  %v745_v50 = vadd.f32 %v737_v24, %v720_v42  ;;  %v1016_v47 = vadd.f32 %v1008_v61, %v991_v27  ;;  %v967_v2 = vadd.f32 %v959_v63, %v942_v38  ;;  %v4012_v56 = vld [vmem:[#allocation10_spill] sm:$0xff]  ;;  %v4013_v29 = vld [vmem:[#allocation21_spill] sm:$0xff]  ;;  %v4015_v63 = vld [vmem:[#allocation15_spill] sm:$0xff] }
 0x115   : > { %v819_v8 = vadd.f32 %v4007_v18, %v794_v41  ;;  %v918_v39 = vadd.f32 %v910_v7, %v893_v22  ;;  %v935_v20 = vmul.f32 %v927_v44, %v4005_v53  ;;  %v1058_v17 = vmul.f32 %v1050_v45, %v3492_v62  ;;  %v878_v62 = vld [vmem:[#allocation2 + $0x3b0] sm:$0xff]  ;;  %v1150_v42 = vld [vmem:[#allocation2 + $0x658] sm:$0xff]  ;;  %v1027_v45 = vld [vmem:[#allocation2 + $0x528] sm:$0xff] }
 0x116   : > { %2449 = vmatprep.mubr.msk.f32.mxu0 %vm1215_vm7, %v1190_v0  ;;  %v770_v54 = vadd.f32 %v762_v60, %v745_v50  ;;  %v1041_v28 = vadd.f32 %v1033_v9, %v1016_v47  ;;  %v992_v31 = vadd.f32 %v984_v10, %v967_v2  ;;  %v1009_v19 = vmul.f32 %v1001_v5, %v4005_v53  ;;  %v4014_v61 = vld [vmem:[#allocation9_spill] sm:$0xff]  ;;  %v1101_v9 = vld [vmem:[#allocation2 + $0x5e0] sm:$0xff]  ;;  %v1052_v2 = vld [vmem:[#allocation2 + $0x568] sm:$0xff] }
 0x117   : > { %v861_v6 = vmul.f32 %v853_v37, %v4008_v15  ;;  %v3535_v14 = vmul.f32 %v854_v36, %v4009_v16  ;;  %v943_v41 = vadd.f32 %v935_v20, %v918_v39  ;;  %v960_v11 = vmul.f32 %v952_v58, %v4006_v3  ;;  %v4016_v10 = vld [vmem:[#allocation13_spill] sm:$0xff]  ;;  %v879_v37 = vld [vmem:[#allocation2 + $0x3b8] sm:$0xff] }
 0x118   : > { %v795_v38 = vadd.f32 %v4010_v46, %v770_v54  ;;  %v1066_v24 = vadd.f32 %v1058_v17, %v1041_v28  ;;  %v1017_v35 = vadd.f32 %v1009_v19, %v992_v31  ;;  %v1034_v55 = vmul.f32 %v1026_v49, %v4006_v3  ;;  %v1175_v18 = vld [vmem:[#allocation2 + $0x698] sm:$0xff]  ;;  %v4018_v54 = vld [vmem:[#allocation24_spill] sm:$0xff] }
 0x119   : > { %v844_v32 = vadd.f32 %v4011_v33, %v819_v8  ;;  %v1108_v52 = vmul.f32 %v1100_v1, %v3506_v4  ;;  %v968_v12 = vadd.f32 %v960_v11, %v943_v41  ;;  %v985_v60 = vmul.f32 %v977_v25, %v4012_v56  ;;  %v1126_v8 = vld [vmem:[#allocation2 + $0x620] sm:$0xff]  ;;  %v4017_v20 = vld [vmem:[#allocation14_spill] sm:$0xff]  ;;  %v1077_v25 = vld [vmem:[#allocation2 + $0x5a8] sm:$0xff] }
 0x11a   : > { %v820_v51 = vadd.f32 %v4013_v29, %v795_v38  ;;  %v1091_v59 = vadd.f32 %v4014_v61, %v1066_v24  ;;  %v1042_v44 = vadd.f32 %v1034_v55, %v1017_v35  ;;  %v1059_v27 = vmul.f32 %v1051_v26, %v4008_v15  ;;  %v4019_v15 = vld [vmem:[#allocation25_spill] sm:$0xff]  ;;  %v1102_v38 = vld [vmem:[#allocation2 + $0x5e8] sm:$0xff]  ;;  %v904_v35 = vld [vmem:[#allocation2 + $0x3f8] sm:$0xff] }
 0x11b   : > { %v886_v22 = vmul.f32 %v878_v62, %v4015_v63  ;;  %v911_v7 = vmul.f32 %v903_v13, %v4012_v56  ;;  %v993_v4 = vadd.f32 %v985_v60, %v968_v12  ;;  %v1010_v5 = vmul.f32 %v1002_v30, %v4016_v10  ;;  %v953_v24 = vld [vmem:[#allocation2 + $0x470] sm:$0xff]  ;;  %v1176_v55 = vld [vmem:[#allocation2 + $0x6a0] sm:$0xff]  ;;  %v4020_v33 = vld [vmem:[#allocation8_spill] sm:$0xff] }
 0x11c   : > { %v1116_v36 = vadd.f32 %v1108_v52, %v1091_v59  ;;  %v1133_v0 = vmul.f32 %v1125_v23, %v2997_v21  ;;  %v1067_v50 = vadd.f32 %v1059_v27, %v1042_v44  ;;  %v1084_v47 = vmul.f32 %v1076_v57, %v2913_v34  ;;  %v928_v21 = vld [vmem:[#allocation2 + $0x430] sm:$0xff]  ;;  %v1151_v34 = vld [vmem:[#allocation2 + $0x660] sm:$0xff]  ;;  %v1127_v60 = vld [vmem:[#allocation2 + $0x628] sm:$0xff] }
 0x11d   : > { %v1158_v58 = vmul.f32 %v1150_v42, %v4005_v53  ;;  %v1018_v39 = vadd.f32 %v1010_v5, %v993_v4  ;;  %v1035_v17 = vmul.f32 %v1027_v45, %v4017_v20  ;;  %v869_v49 = vadd.f32 %v861_v6, %v844_v32  ;;  %v978_v29 = vld [vmem:[#allocation2 + $0x4b0] sm:$0xff]  ;;  %v929_v42 = vld [vmem:[#allocation2 + $0x438] sm:$0xff]  ;;  %v4021_v44 = vld [vmem:[#allocation27_spill] sm:$0xff] }
 0x11e   : > { %v845_v28 = vadd.f32 %v4018_v54, %v820_v51  ;;  %v1141_v1 = vadd.f32 %v1133_v0, %v1116_v36  ;;  %v1092_v31 = vadd.f32 %v1084_v47, %v1067_v50  ;;  %v1109_v19 = vmul.f32 %v1101_v9, %v4015_v63  ;;  %v1177_v0 = vld [vmem:[#allocation2 + $0x6a8] sm:$0xff]  ;;  %v1028_v50 = vld [vmem:[#allocation2 + $0x530] sm:$0xff] }
 0x11f   : > { %v887_v41 = vmul.f32 %v879_v37, %v4019_v15  ;;  %v1043_v26 = vadd.f32 %v1035_v17, %v1018_v39  ;;  %v1060_v53 = vmul.f32 %v1052_v2, %v4009_v16  ;;  %v894_v11 = vadd.f32 %v886_v22, %v869_v49  ;;  %v1152_v22 = vld [vmem:[#allocation2 + $0x668] sm:$0xff]  ;;  %v954_v37 = vld [vmem:[#allocation2 + $0x478] sm:$0xff]  ;;  %v1053_v49 = vld [vmem:[#allocation2 + $0x570] sm:$0xff] }
 0x120   : > { %v1166_v62 = vadd.f32 %v1158_v58, %v1141_v1  ;;  %v1183_v13 = vmul.f32 %v1175_v18, %v4006_v3  ;;  %v1117_v46 = vadd.f32 %v1109_v19, %v1092_v31  ;;  %v1134_v6 = vmul.f32 %v1126_v8, %v4012_v56  ;;  %v4022_v2 = vld [vmem:[#allocation28_spill] sm:$0xff]  ;;  %v979_v17 = vld [vmem:[#allocation2 + $0x4b8] sm:$0xff] }
 0x121   : > { %v1068_v30 = vadd.f32 %v1060_v53, %v1043_v26  ;;  %v1085_v32 = vmul.f32 %v1077_v25, %v4020_v33  ;;  %v919_v52 = vadd.f32 %v911_v7, %v894_v11  ;;  %v936_v23 = vmul.f32 %v928_v21, %v4016_v10  ;;  %v1003_v7 = vld [vmem:[#allocation2 + $0x4f0] sm:$0xff]  ;;  %v1054_v33 = vld [vmem:[#allocation2 + $0x578] sm:$0xff] }
 0x122   : > { %v1191_v57 = vadd.f32 %v1183_v13, %v1166_v62  ;;  %v1142_v12 = vadd.f32 %v1134_v6, %v1117_v46  ;;  %v1159_v16 = vmul.f32 %v1151_v34, %v4016_v10  ;;  %v870_v3 = vadd.f32 %v3535_v14, %v845_v28  ;;  %v4023_v28 = vld [vmem:[#allocation32_spill] sm:$0xff]  ;;  %v4024_v62 = vld [vmem:[#allocation26_spill] sm:$0xff]  ;;  %v1103_v6 = vld [vmem:[#allocation2 + $0x5f0] sm:$0xff] }
 0x123   : > { %v1093_v51 = vadd.f32 %v1085_v32, %v1068_v30  ;;  %v1110_v56 = vmul.f32 %v1102_v38, %v4019_v15  ;;  %v944_v61 = vadd.f32 %v936_v23, %v919_v52  ;;  %v961_v59 = vmul.f32 %v953_v24, %v4017_v20  ;;  %v1004_v15 = vld [vmem:[#allocation2 + $0x4f8] sm:$0xff]  ;;  %v1128_v32 = vld [vmem:[#allocation2 + $0x630] sm:$0xff]  ;;  %v4026_v23 = vld [vmem:[#allocation31_spill] sm:$0xff] }
 0x124   : > { %v912_v27 = vmul.f32 %v904_v35, %v4021_v44  ;;  %2450 = vmatmul.mubr.msk.f32.gmra.mxu0 %vm1215_vm7, %v1191_v57  ;;  %v1167_v45 = vadd.f32 %v1159_v16, %v1142_v12  ;;  %v1184_v63 = vmul.f32 %v1176_v55, %v4017_v20  ;;  %v895_v9 = vadd.f32 %v887_v41, %v870_v3  ;;  %v1078_v41 = vld [vmem:[#allocation2 + $0x5b0] sm:$0xff]  ;;  %v1029_v46 = vld [vmem:[#allocation2 + $0x538] sm:$0xff]  ;;  %v4025_v55 = vld [vmem:[#allocation23_spill] sm:$0xff] }
 0x125   : > { %v1118_v4 = vadd.f32 %v1110_v56, %v1093_v51  ;;  %v1135_v14 = vmul.f32 %v1127_v60, %v4021_v44  ;;  %v969_v10 = vadd.f32 %v961_v59, %v944_v61  ;;  %v986_v5 = vmul.f32 %v978_v29, %v4021_v44  ;;  %v4027_v16 = vld [vmem:[#allocation30_spill] sm:$0xff]  ;;  %v1153_v3 = vld [vmem:[#allocation2 + $0x670] sm:$0xff] }
 0x126   : > { %v1192_v36 = vadd.f32 %v1184_v63, %v1167_v45  ;;  %v920_v47 = vadd.f32 %v912_v27, %v895_v9  ;;  %v937_v58 = vmul.f32 %v929_v42, %v4022_v2  ;;  %v1160_v8 = vmul.f32 %v1152_v22, %v4022_v2  ;;  %v1079_v29 = vld [vmem:[#allocation2 + $0x5b8] sm:$0xff]  ;;  %v4028_v56 = vld [vmem:[#allocation29_spill] sm:$0xff] }
 0x127   : > { %v1143_v18 = vadd.f32 %v1135_v14, %v1118_v4  ;;  %v994_v39 = vadd.f32 %v986_v5, %v969_v10  ;;  %v1011_v20 = vmul.f32 %v1003_v7, %v4022_v2  ;;  %v962_v1 = vmul.f32 %v954_v37, %v4023_v28  ;;  %v1104_v44 = vld [vmem:[#allocation2 + $0x5f8] sm:$0xff]  ;;  %v1178_v27 = vld [vmem:[#allocation2 + $0x6b0] sm:$0xff]  ;;  %v4030_v10 = vld [vmem:[#allocation35_spill] sm:$0xff] }
 0x128   : > { %2452 = vmatprep.mubr.msk.f32.mxu0 %vm1215_vm7, %v1192_v36  ;;  %v945_v54 = vadd.f32 %v937_v58, %v920_v47  ;;  %v1185_v19 = vmul.f32 %v1177_v0, %v4023_v28  ;;  %v1036_v21 = vmul.f32 %v1028_v50, %v4023_v28  ;;  %v987_v26 = vmul.f32 %v979_v17, %v3097_v48  ;;  %v4029_v63 = vld [vmem:[#allocation18_spill] sm:$0xff]  ;;  %v4031_v47 = vld [vmem:[#allocation33_spill] sm:$0xff] }
 0x129   : > { %v1168_v31 = vadd.f32 %v1160_v8, %v1143_v18  ;;  %v1019_v25 = vadd.f32 %v1011_v20, %v994_v39  ;;  %v1061_v13 = vmul.f32 %v1053_v49, %v4024_v62  ;;  %v1012_v24 = vmul.f32 %v1004_v15, %v3130_v40  ;;  %v1129_v4 = vld [vmem:[#allocation2 + $0x638] sm:$0xff] }
 0x12a   : > { %v970_v34 = vadd.f32 %v962_v1, %v945_v54  ;;  %v1086_v30 = vmul.f32 %v1078_v41, %v4025_v55  ;;  %v1037_v57 = vmul.f32 %v1029_v46, %v4026_v23  ;;  %v1111_v60 = vmul.f32 %v1103_v6, %v4027_v16  ;;  %v1154_v0 = vld [vmem:[#allocation2 + $0x678] sm:$0xff] }
 0x12b   : > { %v1193_v53 = vadd.f32 %v1185_v19, %v1168_v31  ;;  %v1044_v11 = vadd.f32 %v1036_v21, %v1019_v25  ;;  %v1062_v61 = vmul.f32 %v1054_v33, %v4028_v56  ;;  %v1136_v42 = vmul.f32 %v1128_v32, %v3097_v48  ;;  %v1179_v58 = vld [vmem:[#allocation2 + $0x6b8] sm:$0xff]  ;;  %v2294_v21 = vld [vmem:[%s3887_s3] ss:$0 sm:$0xff] }
 0x12c   : > { %v995_v38 = vadd.f32 %v987_v26, %v970_v34  ;;  %v1087_v22 = vmul.f32 %v1079_v29, %v4029_v63  ;;  %v1161_v9 = vmul.f32 %v1153_v3, %v3130_v40  ;;  %v1112_v5 = vmul.f32 %v1104_v44, %v4030_v10  ;;  %v4032_v8 = vld [vmem:[#allocation34_spill] sm:$0xff]  ;;  %v1345_v32 = vld [vmem:[#allocation4] sm:$0xff]  ;;  %v3638_v3 = vld [vmem:[%s3889_s5 + $0x8] sm:$0xff] }
 0x12d   : > { %2453 = vmatmul.mubr.msk.f32.gmra.mxu0 %vm1215_vm7, %v1193_v53  ;;  %v1069_v35 = vadd.f32 %v1061_v13, %v1044_v11  ;;  %v1186_v36 = vmul.f32 %v1178_v27, %v4026_v23  ;;  %v1137_v2 = vmul.f32 %v1129_v4, %v4031_v47  ;;  %v1162_v39 = vmul.f32 %v1154_v0, %v4032_v8  ;;  %v3620_v23 = vld [vmem:[%s3889_s5 + $0x18] sm:$0xff]  ;;  %v3647_v56 = vld [vmem:[%s3889_s5] sm:$0xff] }
 0x12e   : > { %v1020_v52 = vadd.f32 %v1012_v24, %v995_v38  ;;  %v1187_v40 = vmul.f32 %v1179_v58, %v3279_v43  ;;  %v2707_v49 = vmov 0.0  }
 0x12f   : > { %v1094_v12 = vadd.f32 %v1086_v30, %v1069_v35  ;;  %2458 = vmatprep.subr.mxu1 %v2707_v49  ;;  %2474 = vmatprep.mubr.msk.f32.mxu1 %vm2709_vm8, %v2707_v49 }
 0x130   : > { %v1045_v51 = vadd.f32 %v1037_v57, %v1020_v52 }
 0x131   : > { %v1119_v59 = vadd.f32 %v1111_v60, %v1094_v12  ;;  %v3627_v12 = vld [vmem:[%s3889_s5 + $0x10] sm:$0xff] }
 0x132   : > { %v1070_v45 = vadd.f32 %v1062_v61, %v1045_v51 }
 0x133   : > { %v1144_v7 = vadd.f32 %v1136_v42, %v1119_v59 }
 0x134   : > { %v1095_v14 = vadd.f32 %v1087_v22, %v1070_v45 }
 0x135   : > { %v1169_v37 = vadd.f32 %v1161_v9, %v1144_v7 }
 0x136   : > { %v1120_v50 = vadd.f32 %v1112_v5, %v1095_v14 }
 0x137   : > { %v1194_v48 = vadd.f32 %v1186_v36, %v1169_v37 }
 0x138   : > { %v1145_v18 = vadd.f32 %v1137_v2, %v1120_v50 }
 0x139   : > { %2455 = vmatprep.mubr.msk.f32.mxu0 %vm1215_vm7, %v1194_v48 }
 0x13a   : > { %v1170_v20 = vadd.f32 %v1162_v39, %v1145_v18 }
 0x13c   : > { %v1195_v17 = vadd.f32 %v1187_v40, %v1170_v20 }
 0x13e   : > { %2456 = vmatmul.mubr.msk.f32.gmra.mxu0 %vm1215_vm7, %v1195_v17 }
 0x1cd   : > { %v2448_v54 = vpop.f32.mrf.mxu0 }
 0x1ce   : > { %v1312_v13 = vadd.f32 %v2448_v54, %v2294_v21 }
 0x1cf   : > { %v1306_v28 = vpop.f32.mrf.mxu0 }
 0x1d0   : > { %v1307_v46 = vadd.f32 %v2294_v21, %v1306_v28 }
 0x1e4   : > { %v2451_v1 = vpop.f32.mrf.mxu0 }
 0x1e5   : > { %v1322_v11 = vadd.f32 %v2451_v1, %v2294_v21  ;;  %v1765_v1 = vld [vmem:[%s3890_s6 + $0x18] sm:$0xff] }
 0x1e6   : > { %v1316_v31 = vpop.f32.mrf.mxu0  ;;  %2497 = vmatprep.subr.mxu0 %v1765_v1 }
 0x1e7   : > { %v1317_v62 = vadd.f32 %v2294_v21, %v1316_v31  ;;  %2498 = vmatpush3.msra.mxu0 %v1765_v1 }
 0x1ed   : > { %v2454_v19 = vpop.f32.mrf.mxu0 }
 0x1ee   : > { %v3604_v26 = vadd.f32 %v2454_v19, %v2294_v21 }
 0x1ef   : > { %v1326_v25 = vpop.f32.mrf.mxu0 }
 0x1f0   : > { %v1327_v53 = vadd.f32 %v2294_v21, %v1326_v25 }
 0x1fe   : > { %v2457_v15 = vpop.f32.mrf.mxu0 }
 0x1ff   : > { %v3598_v41 = vadd.f32 %v2457_v15, %v2294_v21  ;;  %v1764_v15 = vld [vmem:[%s3890_s6 + $0x10] sm:$0xff] }
 0x200   : > { %v1336_v34 = vpop.f32.mrf.mxu0  ;;  %2499 = vmatprep.subr.mxu0 %v1764_v15 }
 0x201   : > { %v3600_v43 = vadd.f32 %v2294_v21, %v1336_v34  ;;  %1368 = vrot.lane.b32.xlu0 %v3598_v41, %s2708_s21  ;;  %2500 = vmatpush3.msra.mxu0 %v1764_v15 }
 0x203   : > { %1366 = vrot.lane.b32.xlu1 %v3600_v43, %s2708_s21 }
 0x205   : > { %1364 = vrot.lane.b32.xlu0 %v3604_v26, %s2708_s21 }
 0x207   : > { %1362 = vrot.lane.b32.xlu1 %v1327_v53, %s2708_s21 }
 0x209   : > { %1360 = vrot.lane.b32.xlu0 %v1322_v11, %s2708_s21 }
 0x20b   : > { %1358 = vrot.lane.b32.xlu1 %v1317_v62, %s2708_s21 }
 0x20d   : > { %1356 = vrot.lane.b32.xlu0 %v1312_v13, %s2708_s21 }
 0x20f   : > { %1354 = vrot.lane.b32.xlu1 %v1307_v46, %s2708_s21 }
 0x273   : > { %v1369_v6 = vpop.permute.xlu0 %1368 }
 0x274   : > { %2459 = vmatpush3.msra.mxu1 %v1369_v6 }
 0x275   : > { %2460 = vmatprep.subr.mxu1 %v2707_v49  ;;  %v1367_v38 = vpop.permute.xlu1 %1366 }
 0x276   : > { %2461 = vmatpush3.msra.mxu1 %v1367_v38 }
 0x277   : > { %v1365_v24 = vpop.permute.xlu0 %1364  ;;  %2462 = vmatprep.subr.mxu1 %v2707_v49 }
 0x278   : > { %2463 = vmatpush3.msra.mxu1 %v1365_v24 }
 0x279   : > { %2464 = vmatprep.subr.mxu1 %v2707_v49  ;;  %v1363_v35 = vpop.permute.xlu1 %1362 }
 0x27a   : > { %2465 = vmatpush3.msra.mxu1 %v1363_v35 }
 0x27b   : > { %v1361_v55 = vpop.permute.xlu0 %1360  ;;  %2466 = vmatprep.subr.mxu1 %v2707_v49 }
 0x27c   : > { %2467 = vmatpush3.msra.mxu1 %v1361_v55 }
 0x27d   : > { %2468 = vmatprep.subr.mxu1 %v2707_v49  ;;  %v1359_v30 = vpop.permute.xlu1 %1358 }
 0x27e   : > { %2469 = vmatpush3.msra.mxu1 %v1359_v30 }
 0x27f   : > { %v1357_v33 = vpop.permute.xlu0 %1356  ;;  %2470 = vmatprep.subr.mxu1 %v2707_v49 }
 0x280   : > { %2471 = vmatpush3.msra.mxu1 %v1357_v33 }
 0x281   : > { %2472 = vmatprep.subr.mxu1 %v2707_v49  ;;  %v1355_v52 = vpop.permute.xlu1 %1354 }
 0x282   : > { %2473 = vmatpush3.msra.mxu1 %v1355_v52 }
 0x283   : > { %2475 = vmatmul.mubr.msk.f32.vlgmr.msra.gmra.mxu1 %vm434_vm1, %v1345_v32 }
 0x284   : > { %2485 = vmatprep.mubr.msk.f32.mxu1 %vm425_vm0, %v1307_v46 }
 0x343   : > { %v3622_v57 = vpop.f32.mrf.mxu1 }
 0x344   : > { %v1458_v16 = vmul.f32 %v3620_v23, %v3622_v57  ;;  %v1457_v29 = vmul.f32 %v3627_v12, %v3622_v57  ;;  %v1456_v51 = vmul.f32 %v3638_v3, %v3622_v57  ;;  %v1455_v61 = vmul.f32 %v3647_v56, %v3622_v57 }
 0x345   : > { %v2476_v60 = vpop.f32.mrf.mxu1 }
 0x346   : > { %2477 = vmatprep.subr.msk.mxu1 %vm425_vm0, %v1458_v16 }
 0x347   : > { %2478 = vmatpush3.xpose.msk.msra.mxu1 %vm425_vm0, %v1458_v16 }
 0x348   : > { %2479 = vmatprep.subr.msk.mxu1 %vm425_vm0, %v1457_v29 }
 0x34b   : > { %2480 = vmatpush3.xpose.msk.msra.mxu1 %vm425_vm0, %v1457_v29 }
 0x34c   : > { %2481 = vmatprep.subr.msk.mxu1 %vm425_vm0, %v1456_v51 }
 0x34f   : > { %2482 = vmatpush3.xpose.msk.msra.mxu1 %vm425_vm0, %v1456_v51 }
 0x350   : > { %2483 = vmatprep.subr.msk.mxu1 %vm425_vm0, %v1455_v61 }
 0x353   : > { %2484 = vmatpush3.xpose.msk.msra.mxu1 %vm425_vm0, %v1455_v61 }
 0x356   : > { %2486 = vmatmul.mubr.msk.f32.vlgmr.msra.gmra.mxu1 %vm425_vm0, %v1312_v13 }
 0x357   : > { %2488 = vmatprep.mubr.msk.f32.mxu1 %vm425_vm0, %v1317_v62 }
 0x35a   : > { %2489 = vmatmul.mubr.msk.f32.gmra.mxu1 %vm425_vm0, %v1322_v11 }
 0x35b   : > { %2491 = vmatprep.mubr.msk.f32.mxu1 %vm425_vm0, %v1327_v53 }
 0x35e   : > { %2492 = vmatmul.mubr.msk.f32.gmra.mxu1 %vm425_vm0, %v3604_v26 }
 0x35f   : > { %2494 = vmatprep.mubr.msk.f32.mxu1 %vm425_vm0, %v3600_v43  ;;  %v1762_v43 = vld [vmem:[%s3890_s6] sm:$0xff] }
 0x362   : > { %2495 = vmatmul.mubr.msk.f32.gmra.mxu1 %vm425_vm0, %v3598_v41  ;;  %v1763_v41 = vld [vmem:[%s3890_s6 + $0x8] sm:$0xff] }
 0x363   : > { %2501 = vmatprep.subr.mxu0 %v1763_v41 }
 0x364   : > { %2502 = vmatpush3.msra.mxu0 %v1763_v41 }
 0x365   : > { %2503 = vmatprep.subr.mxu0 %v1762_v43 }
 0x366   : > { %2504 = vmatpush3.msra.mxu0 %v1762_v43 }
 0x416   : > { %v3665_v59 = vpop.f32.mrf.mxu1 }
 0x417   : > { %v1616_v42 = vsel %vm1612_vm9, %v3665_v59, -inf  ;;  %v1641_v45 = vsel %vm1637_vm10, %v3665_v59, -inf  ;;  %v1666_v22 = vsel %vm1662_vm11, %v3665_v59, -inf  ;;  %v1691_v4 = vsel %vm1687_vm12, %v3665_v59, -inf }
 0x418   : > { %1617 = vmax.xlane.f32.xlu0 %v1616_v42  ;;  %v3669_v44 = vpop.f32.mrf.mxu1 }
 0x419   : > { %v1638_v27 = vsel %vm1637_vm10, %v3669_v44, -inf  ;;  %v1663_v63 = vsel %vm1662_vm11, %v3669_v44, -inf  ;;  %v1688_v7 = vsel %vm1687_vm12, %v3669_v44, -inf  ;;  %v1613_v5 = vsel %vm1612_vm9, %v3669_v44, -inf }
 0x41a   : > { %1639 = vmax.xlane.f32.xlu1 %v1638_v27  ;;  %v3681_v9 = vpop.f32.mrf.mxu1 }
 0x41b   : > { %v1622_v14 = vsel %vm1612_vm9, %v3681_v9, -inf  ;;  %v1647_v36 = vsel %vm1637_vm10, %v3681_v9, -inf  ;;  %v1672_v50 = vsel %vm1662_vm11, %v3681_v9, -inf  ;;  %v1697_v48 = vsel %vm1687_vm12, %v3681_v9, -inf }
 0x41c   : > { %1642 = vmax.xlane.f32.xlu0 %v1641_v45  ;;  %v3687_v10 = vpop.f32.mrf.mxu1 }
 0x41d   : > { %v1619_v37 = vsel %vm1612_vm9, %v3687_v10, -inf  ;;  %v1669_v0 = vsel %vm1662_vm11, %v3687_v10, -inf  ;;  %v1694_v47 = vsel %vm1687_vm12, %v3687_v10, -inf  ;;  %v1644_v8 = vsel %vm1637_vm10, %v3687_v10, -inf }
 0x41e   : > { %1664 = vmax.xlane.f32.xlu1 %v1663_v63  ;;  %v3701_v2 = vpop.f32.mrf.mxu1 }
 0x41f   : > { %v1628_v58 = vsel %vm1612_vm9, %v3701_v2, -inf  ;;  %v1653_v20 = vsel %vm1637_vm10, %v3701_v2, -inf  ;;  %v1678_v17 = vsel %vm1662_vm11, %v3701_v2, -inf  ;;  %v1703_v28 = vsel %vm1687_vm12, %v3701_v2, -inf }
 0x420   : > { %1667 = vmax.xlane.f32.xlu0 %v1666_v22  ;;  %v3707_v18 = vpop.f32.mrf.mxu1 }
 0x421   : > { %v1625_v39 = vsel %vm1612_vm9, %v3707_v18, -inf  ;;  %v1675_v40 = vsel %vm1662_vm11, %v3707_v18, -inf  ;;  %v1700_v49 = vsel %vm1687_vm12, %v3707_v18, -inf  ;;  %v1650_v25 = vsel %vm1637_vm10, %v3707_v18, -inf }
 0x422   : > { %1689 = vmax.xlane.f32.xlu1 %v1688_v7  ;;  %v3721_v54 = vpop.f32.mrf.mxu1 }
 0x423   : > { %v1634_v31 = vsel %vm1612_vm9, %v3721_v54, -inf  ;;  %v1659_v34 = vsel %vm1637_vm10, %v3721_v54, -inf  ;;  %v1684_v53 = vsel %vm1662_vm11, %v3721_v54, -inf  ;;  %v1709_v13 = vsel %vm1687_vm12, %v3721_v54, -inf }
 0x424   : > { %1692 = vmax.xlane.f32.xlu0 %v1691_v4  ;;  %v3730_v19 = vpop.f32.mrf.mxu1 }
 0x425   : > { %v1631_v21 = vsel %vm1612_vm9, %v3730_v19, -inf  ;;  %v1681_v26 = vsel %vm1662_vm11, %v3730_v19, -inf  ;;  %v1706_v11 = vsel %vm1687_vm12, %v3730_v19, -inf  ;;  %v1656_v62 = vsel %vm1637_vm10, %v3730_v19, -inf }
 0x426   : > { %1623 = vmax.xlane.f32.xlu1 %v1622_v14 }
 0x428   : > { %1614 = vmax.xlane.f32.xlu0 %v1613_v5 }
 0x42a   : > { %1620 = vmax.xlane.f32.xlu1 %v1619_v37 }
 0x42c   : > { %1648 = vmax.xlane.f32.xlu0 %v1647_v36 }
 0x42e   : > { %1670 = vmax.xlane.f32.xlu1 %v1669_v0 }
 0x430   : > { %1673 = vmax.xlane.f32.xlu0 %v1672_v50 }
 0x432   : > { %1695 = vmax.xlane.f32.xlu1 %v1694_v47 }
 0x434   : > { %1698 = vmax.xlane.f32.xlu0 %v1697_v48 }
 0x436   : > { %1629 = vmax.xlane.f32.xlu1 %v1628_v58 }
 0x438   : > { %1645 = vmax.xlane.f32.xlu0 %v1644_v8 }
 0x43a   : > { %1626 = vmax.xlane.f32.xlu1 %v1625_v39 }
 0x43c   : > { %1654 = vmax.xlane.f32.xlu0 %v1653_v20 }
 0x43e   : > { %1676 = vmax.xlane.f32.xlu1 %v1675_v40 }
 0x440   : > { %1679 = vmax.xlane.f32.xlu0 %v1678_v17 }
 0x442   : > { %1701 = vmax.xlane.f32.xlu1 %v1700_v49 }
 0x444   : > { %1704 = vmax.xlane.f32.xlu0 %v1703_v28 }
 0x446   : > { %1635 = vmax.xlane.f32.xlu1 %v1634_v31 }
 0x448   : > { %1651 = vmax.xlane.f32.xlu0 %v1650_v25 }
 0x44a   : > { %1632 = vmax.xlane.f32.xlu1 %v1631_v21 }
 0x44c   : > { %1660 = vmax.xlane.f32.xlu0 %v1659_v34 }
 0x44e   : > { %1682 = vmax.xlane.f32.xlu1 %v1681_v26 }
 0x450   : > { %1685 = vmax.xlane.f32.xlu0 %v1684_v53 }
 0x452   : > { %1707 = vmax.xlane.f32.xlu1 %v1706_v11 }
 0x454   : > { %1657 = vmax.xlane.f32.xlu0 %v1656_v62 }
 0x458   : > { %1710 = vmax.xlane.f32.xlu0 %v1709_v13 }
 0x463   : > { %1469 = vrot.lane.b32.xlu1 %v3620_v23, %s2705_s29 }
 0x467   : > { %1465 = vrot.lane.b32.xlu1 %v3638_v3, %s2705_s29 }
 0x46b   : > { %1463 = vrot.lane.b32.xlu1 %v3647_v56, %s2705_s29 }
 0x46e   : > { %1467 = vrot.lane.b32.xlu0 %v3627_v12, %s2705_s29 }
 0x4a1   : > { %v1618_v46 = vpop.xlane.xlu0 %1617 }
 0x4a3   : > { %v1640_v6 = vpop.xlane.xlu1 %1639 }
 0x4a5   : > { %v1643_v38 = vpop.xlane.xlu0 %1642 }
 0x4a6   : > { %v1713_v30 = vsel %vm1612_vm9, %v1618_v46, %v1643_v38 }
 0x4a7   : > { %v1665_v24 = vpop.xlane.xlu1 %1664 }
 0x4a9   : > { %v1668_v35 = vpop.xlane.xlu0 %1667 }
 0x4aa   : > { %v1722_v32 = vsel %vm1720_vm13, %v1713_v30, %v1668_v35 }
 0x4ab   : > { %v1690_v55 = vpop.xlane.xlu1 %1689 }
 0x4ad   : > { %v1693_v33 = vpop.xlane.xlu0 %1692 }
 0x4ae   : > { %v1731_v52 = vsel %vm1729_vm14, %v1722_v32, %v1693_v33 }
 0x4af   : > { %v1624_v23 = vpop.xlane.xlu1 %1623  ;;  %v1739_v60 = vsub.f32 %v3665_v59, %v1731_v52 }
 0x4b1   : > { %v1615_v16 = vpop.xlane.xlu0 %1614  ;;  %v1748_v42 = vmul.f32 1.442695, %v1739_v60 }
 0x4b2   : > { %v1712_v12 = vsel %vm1612_vm9, %v1615_v16, %v1640_v6 }
 0x4b3   : > { %v1721_v29 = vsel %vm1720_vm13, %v1712_v12, %v1665_v24  ;;  %v1621_v3 = vpop.xlane.xlu1 %1620 }
 0x4b4   : > { %v1730_v51 = vsel %vm1729_vm14, %v1721_v29, %v1690_v55 }
 0x4b5   : > { %v1738_v56 = vsub.f32 %v3669_v44, %v1730_v51  ;;  %v1649_v61 = vpop.xlane.xlu0 %1648 }
 0x4b6   : > { %v1715_v7 = vsel %vm1612_vm9, %v1624_v23, %v1649_v61 }
 0x4b7   : > { %v1746_v27 = vmul.f32 1.442695, %v1738_v56  ;;  %v1671_v45 = vpop.xlane.xlu1 %1670 }
 0x4b9   : > { %2601 = vpow2.f32 %v1746_v27  ;;  %v1674_v63 = vpop.xlane.xlu0 %1673 }
 0x4ba   : > { %2603 = vpow2.f32 %v1748_v42  ;;  %v1724_v4 = vsel %vm1720_vm13, %v1715_v7, %v1674_v63 }
 0x4bb   : > { %v1696_v22 = vpop.xlane.xlu1 %1695 }
 0x4bd   : > { %v1699_v59 = vpop.xlane.xlu0 %1698 }
 0x4be   : > { %v1733_v14 = vsel %vm1729_vm14, %v1724_v4, %v1699_v59  ;;  %v2059_v59 = vld [vmem:[%s3891_s7 + $0x18] sm:$0xff]  ;;  %v2058_v4 = vld [vmem:[%s3891_s7 + $0x10] sm:$0xff] }
 0x4bf   : > { %v1630_v5 = vpop.xlane.xlu1 %1629  ;;  %v1741_v36 = vsub.f32 %v3681_v9, %v1733_v14  ;;  %2537 = vmatprep.subr.mxu0 %v2059_v59 }
 0x4c1   : > { %v1646_v37 = vpop.xlane.xlu0 %1645  ;;  %v1752_v39 = vmul.f32 1.442695, %v1741_v36 }
 0x4c2   : > { %v1714_v44 = vsel %vm1612_vm9, %v1621_v3, %v1646_v37 }
 0x4c3   : > { %v1723_v0 = vsel %vm1720_vm13, %v1714_v44, %v1671_v45  ;;  %v1627_v50 = vpop.xlane.xlu1 %1626 }
 0x4c4   : > { %v1732_v47 = vsel %vm1729_vm14, %v1723_v0, %v1696_v22 }
 0x4c5   : > { %v1740_v48 = vsub.f32 %v3687_v10, %v1732_v47  ;;  %v1655_v58 = vpop.xlane.xlu0 %1654 }
 0x4c6   : > { %v3781_v8 = vpop.eup %2601  ;;  %v1717_v10 = vsel %vm1612_vm9, %v1630_v5, %v1655_v58 }
 0x4c7   : > { %v3783_v20 = vpop.eup %2603  ;;  %v1750_v40 = vmul.f32 1.442695, %v1740_v48  ;;  %2505 = vmatprep.mubr.msk.f32.mxu0 %vm425_vm0, %v3781_v8  ;;  %v1677_v9 = vpop.xlane.xlu1 %1676 }
 0x4c8   : > { %2506 = vmatmul.mubr.msk.f32.vlgmr.msra.gmra.mxu0 %vm425_vm0, %v3783_v20 }
 0x4c9   : > { %2605 = vpow2.f32 %v1750_v40  ;;  %v1680_v17 = vpop.xlane.xlu0 %1679  ;;  %2538 = vmatpush3.msra.mxu0 %v2059_v59 }
 0x4ca   : > { %2607 = vpow2.f32 %v1752_v39  ;;  %v1726_v1 = vsel %vm1720_vm13, %v1717_v10, %v1680_v17  ;;  %2539 = vmatprep.subr.mxu0 %v2058_v4 }
 0x4cb   : > { %v1702_v49 = vpop.xlane.xlu1 %1701  ;;  %2540 = vmatpush3.msra.mxu0 %v2058_v4 }
 0x4cd   : > { %v1705_v28 = vpop.xlane.xlu0 %1704 }
 0x4ce   : > { %v1735_v31 = vsel %vm1729_vm14, %v1726_v1, %v1705_v28 }
 0x4cf   : > { %v1636_v25 = vpop.xlane.xlu1 %1635  ;;  %v1743_v15 = vsub.f32 %v3701_v2, %v1735_v31 }
 0x4d1   : > { %v1652_v21 = vpop.xlane.xlu0 %1651  ;;  %v1756_v13 = vmul.f32 1.442695, %v1743_v15 }
 0x4d2   : > { %v1716_v41 = vsel %vm1612_vm9, %v1627_v50, %v1652_v21 }
 0x4d3   : > { %v1725_v34 = vsel %vm1720_vm13, %v1716_v41, %v1677_v9  ;;  %v1633_v43 = vpop.xlane.xlu1 %1632 }
 0x4d4   : > { %v1734_v26 = vsel %vm1729_vm14, %v1725_v34, %v1702_v49 }
 0x4d5   : > { %v1742_v53 = vsub.f32 %v3707_v18, %v1734_v26  ;;  %v1661_v11 = vpop.xlane.xlu0 %1660  ;;  %v2057_v26 = vld [vmem:[%s3891_s7 + $0x8] sm:$0xff] }
 0x4d6   : > { %v3797_v62 = vpop.eup %2605  ;;  %v1719_v33 = vsel %vm1612_vm9, %v1636_v25, %v1661_v11  ;;  %2541 = vmatprep.subr.mxu0 %v2057_v26 }
 0x4d7   : > { %v3799_v46 = vpop.eup %2607  ;;  %v1754_v6 = vmul.f32 1.442695, %v1742_v53  ;;  %2508 = vmatprep.mubr.msk.f32.mxu0 %vm425_vm0, %v3797_v62  ;;  %v1683_v2 = vpop.xlane.xlu1 %1682  ;;  %2542 = vmatpush3.msra.mxu0 %v2057_v26  ;;  %v2056_v53 = vld [vmem:[%s3891_s7] sm:$0xff] }
 0x4d8   : > { %2509 = vmatmul.mubr.msk.f32.gmra.mxu0 %vm425_vm0, %v3799_v46  ;;  %2543 = vmatprep.subr.mxu0 %v2056_v53 }
 0x4d9   : > { %2609 = vpow2.f32 %v1754_v6  ;;  %v1686_v38 = vpop.xlane.xlu0 %1685  ;;  %2544 = vmatpush3.msra.mxu0 %v2056_v53 }
 0x4da   : > { %2611 = vpow2.f32 %v1756_v13  ;;  %v1728_v23 = vsel %vm1720_vm13, %v1719_v33, %v1686_v38 }
 0x4db   : > { %v1708_v24 = vpop.xlane.xlu1 %1707 }
 0x4dd   : > { %v1658_v35 = vpop.xlane.xlu0 %1657 }
 0x4de   : > { %v1718_v18 = vsel %vm1612_vm9, %v1633_v43, %v1658_v35  ;;  %v2332_v35 = vld [vmem:[%s3892_s8] ss:$0 sm:$0xff] }
 0x4df   : > { %v1727_v55 = vsel %vm1720_vm13, %v1718_v18, %v1683_v2  ;;  %v1470_v30 = vpop.permute.xlu1 %1469 }
 0x4e0   : > { %v1736_v32 = vsel %vm1729_vm14, %v1727_v55, %v1708_v24  ;;  %v1478_v52 = vmul.f32 %v1470_v30, %v3622_v57 }
 0x4e1   : > { %v1744_v16 = vsub.f32 %v3730_v19, %v1736_v32  ;;  %v1711_v60 = vpop.xlane.xlu0 %1710 }
 0x4e2   : > { %v1737_v12 = vsel %vm1729_vm14, %v1728_v23, %v1711_v60  ;;  %1921 = vrot.lane.b32.xlu0 %v1478_v52, %s2708_s21 }
 0x4e3   : > { %v1758_v29 = vmul.f32 1.442695, %v1744_v16  ;;  %v1745_v3 = vsub.f32 %v3721_v54, %v1737_v12  ;;  %v1466_v51 = vpop.permute.xlu1 %1465 }
 0x4e4   : > { %v1476_v56 = vmul.f32 %v1466_v51, %v3622_v57 }
 0x4e5   : > { %2613 = vpow2.f32 %v1758_v29  ;;  %v1760_v61 = vmul.f32 1.442695, %v1745_v3  ;;  %v1468_v42 = vpop.permute.xlu0 %1467 }
 0x4e6   : > { %v3816_v27 = vpop.eup %2609  ;;  %v1477_v45 = vmul.f32 %v1468_v42, %v3622_v57  ;;  %1917 = vrot.lane.b32.xlu0 %v1476_v56, %s2708_s21 }
 0x4e7   : > { %v3820_v19 = vpop.eup %2611  ;;  %2615 = vpow2.f32 %v1760_v61  ;;  %2511 = vmatprep.mubr.msk.f32.mxu0 %vm425_vm0, %v3816_v27  ;;  %v1464_v63 = vpop.permute.xlu1 %1463 }
 0x4e8   : > { %2512 = vmatmul.mubr.msk.f32.gmra.mxu0 %vm425_vm0, %v3820_v19  ;;  %1919 = vrot.lane.b32.xlu1 %v1477_v45, %s2708_s21  ;;  %v1475_v54 = vmul.f32 %v1464_v63, %v3622_v57 }
 0x4ec   : > { %1915 = vrot.lane.b32.xlu1 %v1475_v54, %s2708_s21 }
 0x4f2   : > { %v2614_v22 = vpop.eup %2613 }
 0x4f3   : > { %2514 = vmatprep.mubr.msk.f32.mxu0 %vm425_vm0, %v2614_v22 }
 0x4f4   : > { %v2616_v7 = vpop.eup %2615 }
 0x4f5   : > { %2515 = vmatmul.mubr.msk.f32.gmra.mxu0 %vm425_vm0, %v2616_v7 }
 0x554   : > { %v1922_v57 = vpop.permute.xlu0 %1921 }
 0x555   : > { %2517 = vmatprep.subr.mxu1 %v1922_v57 }
 0x556   : > { %2518 = vmatpush3.msra.mxu1 %v1922_v57 }
 0x558   : > { %v1918_v5 = vpop.permute.xlu0 %1917 }
 0x55a   : > { %v1920_v14 = vpop.permute.xlu1 %1919 }
 0x55b   : > { %2519 = vmatprep.subr.mxu1 %v1920_v14 }
 0x55c   : > { %2520 = vmatpush3.msra.mxu1 %v1920_v14 }
 0x55d   : > { %2521 = vmatprep.subr.mxu1 %v1918_v5 }
 0x55e   : > { %2522 = vmatpush3.msra.mxu1 %v1918_v5  ;;  %v1916_v37 = vpop.permute.xlu1 %1915 }
 0x55f   : > { %2523 = vmatprep.subr.mxu1 %v1916_v37 }
 0x560   : > { %2524 = vmatpush3.msra.mxu1 %v1916_v37 }
 0x561   : > { %2557 = vmatprep.subr.mxu1 %v2059_v59 }
 0x588   : > { %v2507_v36 = vpop.f32.mrf.mxu0 }
 0x589   : > { %2617 = vrcp.f32 %v2507_v36 }
 0x58a   : > { %v1856_v44 = vpop.f32.mrf.mxu0 }
 0x58b   : > { %2619 = vrcp.f32 %v1856_v44 }
 0x596   : > { %v2618_v0 = vpop.eup %2617 }
 0x597   : > { %v1898_v58 = vmul.f32 %v2618_v0, %v3783_v20 }
 0x598   : > { %v2620_v50 = vpop.eup %2619  ;;  %v2510_v47 = vpop.f32.mrf.mxu0 }
 0x599   : > { %v1896_v48 = vmul.f32 %v2620_v50, %v3781_v8  ;;  %2621 = vrcp.f32 %v2510_v47 }
 0x59a   : > { %v1866_v39 = vpop.f32.mrf.mxu0 }
 0x59b   : > { %2623 = vrcp.f32 %v1866_v39  ;;  %2525 = vmatprep.mubr.msk.f32.mxu1 %vm425_vm0, %v1896_v48 }
 0x59c   : > { %2526 = vmatmul.mubr.msk.f32.vlgmr.msra.gmra.mxu1 %vm425_vm0, %v1898_v58 }
 0x59d   : > { %2561 = vmatpush3.msra.mxu1 %v2059_v59 }
 0x59e   : > { %2558 = vmatprep.subr.mxu1 %v2058_v4 }
 0x59f   : > { %2562 = vmatpush3.msra.mxu1 %v2058_v4 }
 0x5a0   : > { %2559 = vmatprep.subr.mxu1 %v2057_v26 }
 0x5a1   : > { %2563 = vmatpush3.msra.mxu1 %v2057_v26 }
 0x5a2   : > { %2560 = vmatprep.subr.mxu1 %v2056_v53 }
 0x5a3   : > { %2564 = vmatpush3.msra.mxu1 %v2056_v53 }
 0x5a6   : > { %v2622_v40 = vpop.eup %2621 }
 0x5a7   : > { %v1902_v8 = vmul.f32 %v2622_v40, %v3799_v46 }
 0x5a8   : > { %v2624_v9 = vpop.eup %2623  ;;  %v2513_v17 = vpop.f32.mrf.mxu0 }
 0x5a9   : > { %v1900_v49 = vmul.f32 %v2624_v9, %v3797_v62  ;;  %2625 = vrcp.f32 %v2513_v17 }
 0x5aa   : > { %v1876_v10 = vpop.f32.mrf.mxu0 }
 0x5ab   : > { %2627 = vrcp.f32 %v1876_v10  ;;  %2528 = vmatprep.mubr.msk.f32.mxu1 %vm425_vm0, %v1900_v49 }
 0x5ac   : > { %2529 = vmatmul.mubr.msk.f32.gmra.mxu1 %vm425_vm0, %v1902_v8 }
 0x5b5   : > { %v2516_v20 = vpop.f32.mrf.mxu0 }
 0x5b6   : > { %v2626_v28 = vpop.eup %2625  ;;  %2629 = vrcp.f32 %v2516_v20 }
 0x5b7   : > { %v1886_v1 = vpop.f32.mrf.mxu0  ;;  %v1906_v21 = vmul.f32 %v2626_v28, %v3820_v19 }
 0x5b8   : > { %v2628_v31 = vpop.eup %2627  ;;  %2631 = vrcp.f32 %v1886_v1 }
 0x5b9   : > { %v1904_v25 = vmul.f32 %v2628_v31, %v3816_v27 }
 0x5bb   : > { %2531 = vmatprep.mubr.msk.f32.mxu1 %vm425_vm0, %v1904_v25 }
 0x5bc   : > { %2532 = vmatmul.mubr.msk.f32.gmra.mxu1 %vm425_vm0, %v1906_v21 }
 0x5c3   : > { %v2630_v15 = vpop.eup %2629 }
 0x5c4   : > { %v1910_v43 = vmul.f32 %v2630_v15, %v2616_v7 }
 0x5c5   : > { %v2632_v41 = vpop.eup %2631 }
 0x5c6   : > { %v1908_v34 = vmul.f32 %v2632_v41, %v2614_v22 }
 0x5c8   : > { %2534 = vmatprep.mubr.msk.f32.mxu1 %vm425_vm0, %v1908_v34 }
 0x5c9   : > { %2535 = vmatmul.mubr.msk.f32.gmra.mxu1 %vm425_vm0, %v1910_v43 }
 0x65c   : > { %v2527_v11 = vpop.f32.mrf.mxu1 }
 0x65e   : > { %v2017_v62 = vpop.f32.mrf.mxu1 }
 0x65f   : > { %2545 = vmatprep.mubr.msk.f32.mxu0 %vm425_vm0, %v2017_v62 }
 0x660   : > { %2546 = vmatmul.mubr.msk.f32.vlgmr.msra.gmra.mxu0 %vm425_vm0, %v2527_v11 }
 0x66c   : > { %v2530_v13 = vpop.f32.mrf.mxu1 }
 0x66e   : > { %v2027_v46 = vpop.f32.mrf.mxu1 }
 0x66f   : > { %2548 = vmatprep.mubr.msk.f32.mxu0 %vm425_vm0, %v2027_v46 }
 0x670   : > { %2549 = vmatmul.mubr.msk.f32.gmra.mxu0 %vm425_vm0, %v2530_v13 }
 0x67c   : > { %v2533_v6 = vpop.f32.mrf.mxu1 }
 0x67e   : > { %v2037_v2 = vpop.f32.mrf.mxu1 }
 0x67f   : > { %2551 = vmatprep.mubr.msk.f32.mxu0 %vm425_vm0, %v2037_v2 }
 0x680   : > { %2552 = vmatmul.mubr.msk.f32.gmra.mxu0 %vm425_vm0, %v2533_v6 }
 0x689   : > { %v2536_v38 = vpop.f32.mrf.mxu1 }
 0x68b   : > { %v2047_v24 = vpop.f32.mrf.mxu1 }
 0x68c   : > { %2554 = vmatprep.mubr.msk.f32.mxu1 %vm425_vm0, %v2047_v24 }
 0x68d   : > { %2555 = vmatmul.mubr.msk.f32.vlgmr.msra.gmra.mxu1 %vm425_vm0, %v2536_v38 }
 0x720   : > { %v2547_v18 = vpop.f32.mrf.mxu0 }
 0x721   : > { %v2163_v55 = vadd.f32 %v2547_v18, %v2332_v35 }
 0x722   : > { %v2157_v30 = vpop.f32.mrf.mxu0 }
 0x723   : > { %2197 = vst.msk [vmem:[%s360_s15 + $0x8] sm:$0xff] %vm425_vm0, %v2163_v55  ;;  %v2158_v33 = vadd.f32 %v2332_v35, %v2157_v30 }
 0x725   : > { %2196 = vst.msk [vmem:[%s360_s15] sm:$0xff] %vm425_vm0, %v2158_v33 }
 0x730   : > { %v2550_v32 = vpop.f32.mrf.mxu0 }
 0x731   : > { %v2173_v52 = vadd.f32 %v2550_v32, %v2332_v35 }
 0x732   : > { %v2167_v23 = vpop.f32.mrf.mxu0 }
 0x733   : > { %2199 = vst.msk [vmem:[%s360_s15 + $0x18] sm:$0xff] %vm425_vm0, %v2173_v52  ;;  %v2168_v16 = vadd.f32 %v2332_v35, %v2167_v23 }
 0x735   : > { %2198 = vst.msk [vmem:[%s360_s15 + $0x10] sm:$0xff] %vm425_vm0, %v2168_v16 }
 0x740   : > { %v2553_v60 = vpop.f32.mrf.mxu0 }
 0x741   : > { %v2183_v12 = vadd.f32 %v2553_v60, %v2332_v35 }
 0x742   : > { %v2177_v29 = vpop.f32.mrf.mxu0 }
 0x743   : > { %2201 = vst.msk [vmem:[%s360_s15 + $0x28] sm:$0xff] %vm425_vm0, %v2183_v12  ;;  %v2178_v3 = vadd.f32 %v2332_v35, %v2177_v29 }
 0x745   : > { %2200 = vst.msk [vmem:[%s360_s15 + $0x20] sm:$0xff] %vm425_vm0, %v2178_v3 }
 0x74d   : > { %v2556_v51 = vpop.f32.mrf.mxu1 }
 0x74e   : > { %v2193_v56 = vadd.f32 %v2556_v51, %v2332_v35 }
 0x74f   : > { %v2187_v61 = vpop.f32.mrf.mxu1 }
 0x750   : > { %2203 = vst.msk [vmem:[%s360_s15 + $0x38] sm:$0xff] %vm425_vm0, %v2193_v56  ;;  %v2188_v42 = vadd.f32 %v2332_v35, %v2187_v61 }
 0x752   : > { %2202 = vst.msk [vmem:[%s360_s15 + $0x30] sm:$0xff] %vm425_vm0, %v2188_v42 }
 0x753 PF: > { %s21_s30 = sadd.s32 1, %s2699_s30  }
 0x754   : > { %p18_p2 = scmp.ge.s32.totalorder %s21_s30, 4  }
 0x756   :  { %20 = sbr.rel (!%p18_p2) target bundleno = 2 (0x2), region = 121 }
 0x75b   :  { %2225 = vsyncpa [#allocation3], 1 }
 0x75c   :  { %2227 = vsyncpa [#allocation3 + $0x1], 1 }
 0x75d   :  { %2228 = vsyncpa [#allocation5], 1 }

</bundles_post_ra>
